<compile_context>
chip_gen: v7x
topology: tpu7x:2x2x1
jax: 0.10.0
libtpu: 0.0.40
codegen_flags: <defaults>
</compile_context>

<pallas_src>
import jax
import jax.numpy as jnp
import numpy as np
from jax.experimental import pallas as pl
from jax.experimental.pallas import tpu as pltpu  # noqa: F401  (imported per convention)


# ----------------------------- Pallas kernel ------------------------------ #
def _recurrent_kernel(
    # inputs
    x_ref,              # (B, S, IN)
    carry_ref,          # (B, 1, H)
    norm_ref,           # (2, IN): row 0 = mean, row 1 = std
    we1_ref, we2_ref,   # (IN, H), (H, H)   encoder weights
    b_enc_ref,          # (2, H): row 0 = be1, row 1 = be2
    w_ih_ref, w_hh_ref,  # (H, 3H) each, gate order (r, z, n)
    b_gates_ref,        # (2, 3H): row 0 = b_ih, row 1 = b_hh
    wd1_ref, bd1_ref, wd2_ref, bd2_ref,   # decoder
    # outputs
    y_ref,              # (B, 1, OUT)
    carry_out_ref,      # (B, 1, H)  (aliased with carry input)
):
    B, S, IN = x_ref.shape
    H = w_hh_ref.shape[0]

    # ---- hoisted, h-independent compute over all B*S rows ----
    # (B,S,IN) -> (B*S, IN): tile-aligned collapse of leading dims (free relayout).
    x_all = x_ref[...].astype(jnp.float32).reshape(B * S, IN)
    mean = norm_ref[0:1, :]
    std = norm_ref[1:2, :]
    xn = (x_all - mean) / std

    # encoder MLP: Linear -> ReLU -> Linear, batched over B*S rows
    e = jnp.dot(xn, we1_ref[...], preferred_element_type=jnp.float32) + b_enc_ref[0:1, :]
    e = jnp.maximum(e, 0.0)
    e = jnp.dot(e, we2_ref[...], preferred_element_type=jnp.float32) + b_enc_ref[1:2, :]

    # input-side GRU projections for every timestep at once: (B*S, 3H)
    gi_all = jnp.dot(e, w_ih_ref[...], preferred_element_type=jnp.float32) + b_gates_ref[0:1, :]
    gi_all = gi_all.reshape(B, S, 3 * H)

    b_hh = b_gates_ref[1:2, :]       # (1, 3H)
    w_hh = w_hh_ref[...]             # (H, 3H)

    # ---- serial recurrence: only the h-dependent chain stays in the loop ----
    h = carry_ref[:, 0, :].astype(jnp.float32)          # (B, H)
    for t in range(S):                                  # statically unrolled, S is small
        gi = gi_all[:, t, :]                                                   # (B, 3H)
        gh = jnp.dot(h, w_hh, preferred_element_type=jnp.float32) + b_hh       # (B, 3H)
        r = jax.nn.sigmoid(gi[:, 0:H] + gh[:, 0:H])
        z = jax.nn.sigmoid(gi[:, H:2 * H] + gh[:, H:2 * H])
        n = jnp.tanh(gi[:, 2 * H:3 * H] + r * gh[:, 2 * H:3 * H])
        h = (1.0 - z) * n + z * h

    # ---- decoder MLP on the final recurrent output ----
    d = jnp.dot(h, wd1_ref[...], preferred_element_type=jnp.float32) + bd1_ref[...]
    d = jnp.maximum(d, 0.0)
    y = jnp.dot(d, wd2_ref[...], preferred_element_type=jnp.float32) + bd2_ref[...]

    y_ref[:, 0, :] = y.astype(y_ref.dtype)
    carry_out_ref[:, 0, :] = h.astype(carry_out_ref.dtype)


_PACKED_NAMES = ("norm", "we1", "we2", "b_enc", "w_ih", "w_hh", "b_gates",
                 "wd1", "bd1", "wd2", "bd2")


@jax.jit
def deep_recurrent_forward(x, carry, packed):
    """Returns (decoder_output (B,1,OUT), carry (B,1,H)) like the PyTorch forward()."""
    B, S, IN = x.shape
    H = packed["w_hh"].shape[0]
    OUT = packed["wd2"].shape[1]
    weights = [packed[n] for n in _PACKED_NAMES]

    return pl.pallas_call(
        _recurrent_kernel,
        out_shape=(
            jax.ShapeDtypeStruct((B, 1, OUT), x.dtype),
            jax.ShapeDtypeStruct((B, 1, H), x.dtype),
        ),
        # grid-less call: every (tiny) input is a single resident VMEM block,
        # the recurrence is unrolled inside one kernel invocation.
        input_output_aliases={1: 1},   # carry (input 1) aliases carry_out (output 1)
    )(x, carry, *weights)


# -------------------------- host-side param packing ------------------------ #
def pack_params(p):
    """Pack the 22 individual tensors into 11 slabs for the kernel."""
    return {
        "norm": jnp.concatenate([p["mean"], p["std"]], axis=0),            # (2, IN)
        "we1": p["we1"],                                                   # (IN, H)
        "we2": p["we2"],                                                   # (H, H)
        "b_enc": jnp.concatenate([p["be1"], p["be2"]], axis=0),            # (2, H)
        "w_ih": jnp.concatenate([p["wir"], p["wiz"], p["win"]], axis=1),   # (H, 3H)
        "w_hh": jnp.concatenate([p["whr"], p["whz"], p["whn"]], axis=1),   # (H, 3H)
        "b_gates": jnp.concatenate(
            [jnp.concatenate([p["bir"], p["biz"], p["bin"]], axis=1),
             jnp.concatenate([p["bhr"], p["bhz"], p["bhn"]], axis=1)],
            axis=0),                                                       # (2, 3H)
        "wd1": p["wd1"], "bd1": p["bd1"],                                  # (H,H), (1,H)
        "wd2": p["wd2"], "bd2": p["bd2"],                                  # (H,OUT), (1,OUT)
    }


# ------------------------- pure-JAX reference ------------------------------ #
def reference_forward(x, carry, p):
    relu = lambda a: jnp.maximum(a, 0.0)
    sig = jax.nn.sigmoid
    h = carry[:, 0, :]
    for t in range(x.shape[1]):
        xi = (x[:, t, :] - p["mean"]) / p["std"]
        e = relu(xi @ p["we1"] + p["be1"]) @ p["we2"] + p["be2"]
        r = sig(e @ p["wir"] + p["bir"] + h @ p["whr"] + p["bhr"])
        z = sig(e @ p["wiz"] + p["biz"] + h @ p["whz"] + p["bhz"])
        n = jnp.tanh(e @ p["win"] + p["bin"] + r * (h @ p["whn"] + p["bhn"]))
        h = (1.0 - z) * n + z * h
    y = relu(h @ p["wd1"] + p["bd1"]) @ p["wd2"] + p["bd2"]
    return y[:, None, :], h[:, None, :]


# ------------------------------ param init --------------------------------- #
def init_params(key, in_size, hidden, out_size):
    names = [
        ("we1", (in_size, hidden)), ("be1", (1, hidden)),
        ("we2", (hidden, hidden)), ("be2", (1, hidden)),
        ("wir", (hidden, hidden)), ("wiz", (hidden, hidden)), ("win", (hidden, hidden)),
        ("bir", (1, hidden)), ("biz", (1, hidden)), ("bin", (1, hidden)),
        ("whr", (hidden, hidden)), ("whz", (hidden, hidden)), ("whn", (hidden, hidden)),
        ("bhr", (1, hidden)), ("bhz", (1, hidden)), ("bhn", (1, hidden)),
        ("wd1", (hidden, hidden)), ("bd1", (1, hidden)),
        ("wd2", (hidden, out_size)), ("bd2", (1, out_size)),
    ]
    params = {
        # DeepLearnableModel.__init__: mean = ones(in_size), std = ones(in_size)
        "mean": jnp.ones((1, in_size), jnp.float32),
        "std": jnp.ones((1, in_size), jnp.float32),
    }
    keys = jax.random.split(key, len(names))
    for k, (name, shape) in zip(keys, names):
        params[name] = (0.1 * jax.random.normal(k, shape)).astype(jnp.float32)
    return params


# --------------------------------- main ------------------------------------ #
if __name__ == "__main__":
    B, S, IN, H, OUT = 2, 8, 4, 32, 8

    root = jax.random.PRNGKey(0)
    kx, kc, kp = jax.random.split(root, 3)
    x = jax.random.normal(kx, (B, S, IN), jnp.float32)
    carry = jax.random.normal(kc, (B, 1, H), jnp.float32)   # (batch, num_layers=1, hidden)
    params = init_params(kp, IN, H, OUT)
    packed = jax.tree_util.tree_map(lambda a: a, pack_params(params))

    y, carry_out = deep_recurrent_forward(x, carry, packed)
    jax.block_until_ready((y, carry_out))

    y_ref, carry_ref = reference_forward(x, carry, params)
    np.testing.assert_allclose(np.asarray(y), np.asarray(y_ref), atol=1e-4, rtol=1e-4)
    np.testing.assert_allclose(np.asarray(carry_out), np.asarray(carry_ref),
                               atol=1e-4, rtol=1e-4)

    print("KERNEL_OK")
</pallas_src>

<mosaic_0001>
module attributes {stable_mosaic.version = 11 : i64} {
  func.func @_recurrent_kernel(%arg0: memref<2x8x4xf32, #tpu.memory_space<vmem>>, %arg1: memref<2x1x32xf32, #tpu.memory_space<vmem>>, %arg2: memref<2x4xf32, #tpu.memory_space<vmem>>, %arg3: memref<4x32xf32, #tpu.memory_space<vmem>>, %arg4: memref<32x32xf32, #tpu.memory_space<vmem>>, %arg5: memref<2x32xf32, #tpu.memory_space<vmem>>, %arg6: memref<32x96xf32, #tpu.memory_space<vmem>>, %arg7: memref<32x96xf32, #tpu.memory_space<vmem>>, %arg8: memref<2x96xf32, #tpu.memory_space<vmem>>, %arg9: memref<32x32xf32, #tpu.memory_space<vmem>>, %arg10: memref<1x32xf32, #tpu.memory_space<vmem>>, %arg11: memref<32x8xf32, #tpu.memory_space<vmem>>, %arg12: memref<1x8xf32, #tpu.memory_space<vmem>>, %arg13: memref<2x1x8xf32, #tpu.memory_space<vmem>>, %arg14: memref<2x1x32xf32, #tpu.memory_space<vmem>>) attributes {dimension_semantics = [], scalar_prefetch = 0 : i64, scratch_operands = 0 : i64, tpu.core_type = #tpu.core_type<tc>} {
    %c0 = arith.constant 0 : index
    %c0_0 = arith.constant 0 : index
    %c0_1 = arith.constant 0 : index
    %0 = vector.load %arg0[%c0, %c0_0, %c0_1] : memref<2x8x4xf32, #tpu.memory_space<vmem>>, vector<2x8x4xf32>
    %1 = vector.shape_cast %0 : vector<2x8x4xf32> to vector<16x4xf32>
    %c0_2 = arith.constant 0 : index
    %c0_3 = arith.constant 0 : index
    %2 = vector.load %arg2[%c0_2, %c0_3] : memref<2x4xf32, #tpu.memory_space<vmem>>, vector<1x4xf32>
    %c1 = arith.constant 1 : index
    %c0_4 = arith.constant 0 : index
    %3 = vector.load %arg2[%c1, %c0_4] : memref<2x4xf32, #tpu.memory_space<vmem>>, vector<1x4xf32>
    %4 = vector.broadcast %2 : vector<1x4xf32> to vector<16x4xf32>
    %5 = arith.subf %1, %4 : vector<16x4xf32>
    %6 = vector.broadcast %3 : vector<1x4xf32> to vector<16x4xf32>
    %7 = arith.divf %5, %6 : vector<16x4xf32>
    %c0_5 = arith.constant 0 : index
    %c0_6 = arith.constant 0 : index
    %8 = vector.load %arg3[%c0_5, %c0_6] : memref<4x32xf32, #tpu.memory_space<vmem>>, vector<4x32xf32>
    %cst = arith.constant dense<0.000000e+00> : vector<16x32xf32>
    %9 = tpu.matmul %7, %8, %cst {dimension_numbers = #tpu.dot_dimension_numbers<[1], [0], [0], [1], [0, 0, 1, 1], [], []>} : vector<16x4xf32>, vector<4x32xf32>, vector<16x32xf32> -> vector<16x32xf32>
    %c0_7 = arith.constant 0 : index
    %c0_8 = arith.constant 0 : index
    %10 = vector.load %arg5[%c0_7, %c0_8] : memref<2x32xf32, #tpu.memory_space<vmem>>, vector<1x32xf32>
    %11 = vector.broadcast %10 : vector<1x32xf32> to vector<16x32xf32>
    %12 = arith.addf %9, %11 : vector<16x32xf32>
    %cst_9 = arith.constant 0.000000e+00 : f32
    %13 = vector.broadcast %cst_9 : f32 to vector<16x32xf32>
    %14 = arith.maximumf %12, %13 : vector<16x32xf32>
    %c0_10 = arith.constant 0 : index
    %c0_11 = arith.constant 0 : index
    %15 = vector.load %arg4[%c0_10, %c0_11] : memref<32x32xf32, #tpu.memory_space<vmem>>, vector<32x32xf32>
    %cst_12 = arith.constant dense<0.000000e+00> : vector<16x32xf32>
    %16 = tpu.matmul %14, %15, %cst_12 {dimension_numbers = #tpu.dot_dimension_numbers<[1], [0], [0], [1], [0, 0, 1, 1], [], []>} : vector<16x32xf32>, vector<32x32xf32>, vector<16x32xf32> -> vector<16x32xf32>
    %c1_13 = arith.constant 1 : index
    %c0_14 = arith.constant 0 : index
    %17 = vector.load %arg5[%c1_13, %c0_14] : memref<2x32xf32, #tpu.memory_space<vmem>>, vector<1x32xf32>
    %18 = vector.broadcast %17 : vector<1x32xf32> to vector<16x32xf32>
    %19 = arith.addf %16, %18 : vector<16x32xf32>
    %c0_15 = arith.constant 0 : index
    %c0_16 = arith.constant 0 : index
    %20 = vector.load %arg6[%c0_15, %c0_16] : memref<32x96xf32, #tpu.memory_space<vmem>>, vector<32x96xf32>
    %cst_17 = arith.constant dense<0.000000e+00> : vector<16x96xf32>
    %21 = tpu.matmul %19, %20, %cst_17 {dimension_numbers = #tpu.dot_dimension_numbers<[1], [0], [0], [1], [0, 0, 1, 1], [], []>} : vector<16x32xf32>, vector<32x96xf32>, vector<16x96xf32> -> vector<16x96xf32>
    %c0_18 = arith.constant 0 : index
    %c0_19 = arith.constant 0 : index
    %22 = vector.load %arg8[%c0_18, %c0_19] : memref<2x96xf32, #tpu.memory_space<vmem>>, vector<1x96xf32>
    %23 = vector.broadcast %22 : vector<1x96xf32> to vector<16x96xf32>
    %24 = arith.addf %21, %23 : vector<16x96xf32>
    %25 = vector.shape_cast %24 : vector<16x96xf32> to vector<2x8x96xf32>
    %c1_20 = arith.constant 1 : index
    %c0_21 = arith.constant 0 : index
    %26 = vector.load %arg8[%c1_20, %c0_21] : memref<2x96xf32, #tpu.memory_space<vmem>>, vector<1x96xf32>
    %c0_22 = arith.constant 0 : index
    %c0_23 = arith.constant 0 : index
    %27 = vector.load %arg7[%c0_22, %c0_23] : memref<32x96xf32, #tpu.memory_space<vmem>>, vector<32x96xf32>
    %c0_24 = arith.constant 0 : index
    %c0_25 = arith.constant 0 : index
    %c0_26 = arith.constant 0 : index
    %28 = vector.load %arg1[%c0_24, %c0_25, %c0_26] : memref<2x1x32xf32, #tpu.memory_space<vmem>>, vector<2x1x32xf32>
    %29 = vector.shape_cast %28 : vector<2x1x32xf32> to vector<2x32xf32>
    %30 = vector.extract_strided_slice %25 {offsets = [0, 0, 0], sizes = [2, 1, 96], strides = [1, 1, 1]} : vector<2x8x96xf32> to vector<2x1x96xf32>
    %31 = vector.shape_cast %30 : vector<2x1x96xf32> to vector<2x96xf32>
    %cst_27 = arith.constant dense<0.000000e+00> : vector<2x96xf32>
    %32 = tpu.matmul %29, %27, %cst_27 {dimension_numbers = #tpu.dot_dimension_numbers<[1], [0], [0], [1], [0, 0, 1, 1], [], []>} : vector<2x32xf32>, vector<32x96xf32>, vector<2x96xf32> -> vector<2x96xf32>
    %33 = vector.broadcast %26 : vector<1x96xf32> to vector<2x96xf32>
    %34 = arith.addf %32, %33 : vector<2x96xf32>
    %35 = vector.extract_strided_slice %31 {offsets = [0, 0], sizes = [2, 32], strides = [1, 1]} : vector<2x96xf32> to vector<2x32xf32>
    %36 = vector.extract_strided_slice %34 {offsets = [0, 0], sizes = [2, 32], strides = [1, 1]} : vector<2x96xf32> to vector<2x32xf32>
    %37 = arith.addf %35, %36 : vector<2x32xf32>
    %38 = arith.negf %37 : vector<2x32xf32>
    %39 = math.exp %38 : vector<2x32xf32>
    %cst_28 = arith.constant 1.000000e+00 : f32
    %40 = vector.broadcast %cst_28 : f32 to vector<2x32xf32>
    %41 = arith.addf %40, %39 : vector<2x32xf32>
    %42 = arith.divf %40, %41 : vector<2x32xf32>
    %43 = vector.extract_strided_slice %31 {offsets = [0, 32], sizes = [2, 32], strides = [1, 1]} : vector<2x96xf32> to vector<2x32xf32>
    %44 = vector.extract_strided_slice %34 {offsets = [0, 32], sizes = [2, 32], strides = [1, 1]} : vector<2x96xf32> to vector<2x32xf32>
    %45 = arith.addf %43, %44 : vector<2x32xf32>
    %46 = arith.negf %45 : vector<2x32xf32>
    %47 = math.exp %46 : vector<2x32xf32>
    %cst_29 = arith.constant 1.000000e+00 : f32
    %48 = vector.broadcast %cst_29 : f32 to vector<2x32xf32>
    %49 = arith.addf %48, %47 : vector<2x32xf32>
    %50 = arith.divf %48, %49 : vector<2x32xf32>
    %51 = vector.extract_strided_slice %31 {offsets = [0, 64], sizes = [2, 32], strides = [1, 1]} : vector<2x96xf32> to vector<2x32xf32>
    %52 = vector.extract_strided_slice %34 {offsets = [0, 64], sizes = [2, 32], strides = [1, 1]} : vector<2x96xf32> to vector<2x32xf32>
    %53 = arith.mulf %42, %52 : vector<2x32xf32>
    %54 = arith.addf %51, %53 : vector<2x32xf32>
    %55 = math.tanh %54 : vector<2x32xf32>
    %cst_30 = arith.constant 1.000000e+00 : f32
    %56 = vector.broadcast %cst_30 : f32 to vector<2x32xf32>
    %57 = arith.subf %56, %50 : vector<2x32xf32>
    %58 = arith.mulf %57, %55 : vector<2x32xf32>
    %59 = arith.mulf %50, %29 : vector<2x32xf32>
    %60 = arith.addf %58, %59 : vector<2x32xf32>
    %61 = vector.extract_strided_slice %25 {offsets = [0, 1, 0], sizes = [2, 1, 96], strides = [1, 1, 1]} : vector<2x8x96xf32> to vector<2x1x96xf32>
    %62 = vector.shape_cast %61 : vector<2x1x96xf32> to vector<2x96xf32>
    %cst_31 = arith.constant dense<0.000000e+00> : vector<2x96xf32>
    %63 = tpu.matmul %60, %27, %cst_31 {dimension_numbers = #tpu.dot_dimension_numbers<[1], [0], [0], [1], [0, 0, 1, 1], [], []>} : vector<2x32xf32>, vector<32x96xf32>, vector<2x96xf32> -> vector<2x96xf32>
    %64 = vector.broadcast %26 : vector<1x96xf32> to vector<2x96xf32>
    %65 = arith.addf %63, %64 : vector<2x96xf32>
    %66 = vector.extract_strided_slice %62 {offsets = [0, 0], sizes = [2, 32], strides = [1, 1]} : vector<2x96xf32> to vector<2x32xf32>
    %67 = vector.extract_strided_slice %65 {offsets = [0, 0], sizes = [2, 32], strides = [1, 1]} : vector<2x96xf32> to vector<2x32xf32>
    %68 = arith.addf %66, %67 : vector<2x32xf32>
    %69 = arith.negf %68 : vector<2x32xf32>
    %70 = math.exp %69 : vector<2x32xf32>
    %cst_32 = arith.constant 1.000000e+00 : f32
    %71 = vector.broadcast %cst_32 : f32 to vector<2x32xf32>
    %72 = arith.addf %71, %70 : vector<2x32xf32>
    %73 = arith.divf %71, %72 : vector<2x32xf32>
    %74 = vector.extract_strided_slice %62 {offsets = [0, 32], sizes = [2, 32], strides = [1, 1]} : vector<2x96xf32> to vector<2x32xf32>
    %75 = vector.extract_strided_slice %65 {offsets = [0, 32], sizes = [2, 32], strides = [1, 1]} : vector<2x96xf32> to vector<2x32xf32>
    %76 = arith.addf %74, %75 : vector<2x32xf32>
    %77 = arith.negf %76 : vector<2x32xf32>
    %78 = math.exp %77 : vector<2x32xf32>
    %cst_33 = arith.constant 1.000000e+00 : f32
    %79 = vector.broadcast %cst_33 : f32 to vector<2x32xf32>
    %80 = arith.addf %79, %78 : vector<2x32xf32>
    %81 = arith.divf %79, %80 : vector<2x32xf32>
    %82 = vector.extract_strided_slice %62 {offsets = [0, 64], sizes = [2, 32], strides = [1, 1]} : vector<2x96xf32> to vector<2x32xf32>
    %83 = vector.extract_strided_slice %65 {offsets = [0, 64], sizes = [2, 32], strides = [1, 1]} : vector<2x96xf32> to vector<2x32xf32>
    %84 = arith.mulf %73, %83 : vector<2x32xf32>
    %85 = arith.addf %82, %84 : vector<2x32xf32>
    %86 = math.tanh %85 : vector<2x32xf32>
    %cst_34 = arith.constant 1.000000e+00 : f32
    %87 = vector.broadcast %cst_34 : f32 to vector<2x32xf32>
    %88 = arith.subf %87, %81 : vector<2x32xf32>
    %89 = arith.mulf %88, %86 : vector<2x32xf32>
    %90 = arith.mulf %81, %60 : vector<2x32xf32>
    %91 = arith.addf %89, %90 : vector<2x32xf32>
    %92 = vector.extract_strided_slice %25 {offsets = [0, 2, 0], sizes = [2, 1, 96], strides = [1, 1, 1]} : vector<2x8x96xf32> to vector<2x1x96xf32>
    %93 = vector.shape_cast %92 : vector<2x1x96xf32> to vector<2x96xf32>
    %cst_35 = arith.constant dense<0.000000e+00> : vector<2x96xf32>
    %94 = tpu.matmul %91, %27, %cst_35 {dimension_numbers = #tpu.dot_dimension_numbers<[1], [0], [0], [1], [0, 0, 1, 1], [], []>} : vector<2x32xf32>, vector<32x96xf32>, vector<2x96xf32> -> vector<2x96xf32>
    %95 = vector.broadcast %26 : vector<1x96xf32> to vector<2x96xf32>
    %96 = arith.addf %94, %95 : vector<2x96xf32>
    %97 = vector.extract_strided_slice %93 {offsets = [0, 0], sizes = [2, 32], strides = [1, 1]} : vector<2x96xf32> to vector<2x32xf32>
    %98 = vector.extract_strided_slice %96 {offsets = [0, 0], sizes = [2, 32], strides = [1, 1]} : vector<2x96xf32> to vector<2x32xf32>
    %99 = arith.addf %97, %98 : vector<2x32xf32>
    %100 = arith.negf %99 : vector<2x32xf32>
    %101 = math.exp %100 : vector<2x32xf32>
    %cst_36 = arith.constant 1.000000e+00 : f32
    %102 = vector.broadcast %cst_36 : f32 to vector<2x32xf32>
    %103 = arith.addf %102, %101 : vector<2x32xf32>
    %104 = arith.divf %102, %103 : vector<2x32xf32>
    %105 = vector.extract_strided_slice %93 {offsets = [0, 32], sizes = [2, 32], strides = [1, 1]} : vector<2x96xf32> to vector<2x32xf32>
    %106 = vector.extract_strided_slice %96 {offsets = [0, 32], sizes = [2, 32], strides = [1, 1]} : vector<2x96xf32> to vector<2x32xf32>
    %107 = arith.addf %105, %106 : vector<2x32xf32>
    %108 = arith.negf %107 : vector<2x32xf32>
    %109 = math.exp %108 : vector<2x32xf32>
    %cst_37 = arith.constant 1.000000e+00 : f32
    %110 = vector.broadcast %cst_37 : f32 to vector<2x32xf32>
    %111 = arith.addf %110, %109 : vector<2x32xf32>
    %112 = arith.divf %110, %111 : vector<2x32xf32>
    %113 = vector.extract_strided_slice %93 {offsets = [0, 64], sizes = [2, 32], strides = [1, 1]} : vector<2x96xf32> to vector<2x32xf32>
    %114 = vector.extract_strided_slice %96 {offsets = [0, 64], sizes = [2, 32], strides = [1, 1]} : vector<2x96xf32> to vector<2x32xf32>
    %115 = arith.mulf %104, %114 : vector<2x32xf32>
    %116 = arith.addf %113, %115 : vector<2x32xf32>
    %117 = math.tanh %116 : vector<2x32xf32>
    %cst_38 = arith.constant 1.000000e+00 : f32
    %118 = vector.broadcast %cst_38 : f32 to vector<2x32xf32>
    %119 = arith.subf %118, %112 : vector<2x32xf32>
    %120 = arith.mulf %119, %117 : vector<2x32xf32>
    %121 = arith.mulf %112, %91 : vector<2x32xf32>
    %122 = arith.addf %120, %121 : vector<2x32xf32>
    %123 = vector.extract_strided_slice %25 {offsets = [0, 3, 0], sizes = [2, 1, 96], strides = [1, 1, 1]} : vector<2x8x96xf32> to vector<2x1x96xf32>
    %124 = vector.shape_cast %123 : vector<2x1x96xf32> to vector<2x96xf32>
    %cst_39 = arith.constant dense<0.000000e+00> : vector<2x96xf32>
    %125 = tpu.matmul %122, %27, %cst_39 {dimension_numbers = #tpu.dot_dimension_numbers<[1], [0], [0], [1], [0, 0, 1, 1], [], []>} : vector<2x32xf32>, vector<32x96xf32>, vector<2x96xf32> -> vector<2x96xf32>
    %126 = vector.broadcast %26 : vector<1x96xf32> to vector<2x96xf32>
    %127 = arith.addf %125, %126 : vector<2x96xf32>
    %128 = vector.extract_strided_slice %124 {offsets = [0, 0], sizes = [2, 32], strides = [1, 1]} : vector<2x96xf32> to vector<2x32xf32>
    %129 = vector.extract_strided_slice %127 {offsets = [0, 0], sizes = [2, 32], strides = [1, 1]} : vector<2x96xf32> to vector<2x32xf32>
    %130 = arith.addf %128, %129 : vector<2x32xf32>
    %131 = arith.negf %130 : vector<2x32xf32>
    %132 = math.exp %131 : vector<2x32xf32>
    %cst_40 = arith.constant 1.000000e+00 : f32
    %133 = vector.broadcast %cst_40 : f32 to vector<2x32xf32>
    %134 = arith.addf %133, %132 : vector<2x32xf32>
    %135 = arith.divf %133, %134 : vector<2x32xf32>
    %136 = vector.extract_strided_slice %124 {offsets = [0, 32], sizes = [2, 32], strides = [1, 1]} : vector<2x96xf32> to vector<2x32xf32>
    %137 = vector.extract_strided_slice %127 {offsets = [0, 32], sizes = [2, 32], strides = [1, 1]} : vector<2x96xf32> to vector<2x32xf32>
    %138 = arith.addf %136, %137 : vector<2x32xf32>
    %139 = arith.negf %138 : vector<2x32xf32>
    %140 = math.exp %139 : vector<2x32xf32>
    %cst_41 = arith.constant 1.000000e+00 : f32
    %141 = vector.broadcast %cst_41 : f32 to vector<2x32xf32>
    %142 = arith.addf %141, %140 : vector<2x32xf32>
    %143 = arith.divf %141, %142 : vector<2x32xf32>
    %144 = vector.extract_strided_slice %124 {offsets = [0, 64], sizes = [2, 32], strides = [1, 1]} : vector<2x96xf32> to vector<2x32xf32>
    %145 = vector.extract_strided_slice %127 {offsets = [0, 64], sizes = [2, 32], strides = [1, 1]} : vector<2x96xf32> to vector<2x32xf32>
    %146 = arith.mulf %135, %145 : vector<2x32xf32>
    %147 = arith.addf %144, %146 : vector<2x32xf32>
    %148 = math.tanh %147 : vector<2x32xf32>
    %cst_42 = arith.constant 1.000000e+00 : f32
    %149 = vector.broadcast %cst_42 : f32 to vector<2x32xf32>
    %150 = arith.subf %149, %143 : vector<2x32xf32>
    %151 = arith.mulf %150, %148 : vector<2x32xf32>
    %152 = arith.mulf %143, %122 : vector<2x32xf32>
    %153 = arith.addf %151, %152 : vector<2x32xf32>
    %154 = vector.extract_strided_slice %25 {offsets = [0, 4, 0], sizes = [2, 1, 96], strides = [1, 1, 1]} : vector<2x8x96xf32> to vector<2x1x96xf32>
    %155 = vector.shape_cast %154 : vector<2x1x96xf32> to vector<2x96xf32>
    %cst_43 = arith.constant dense<0.000000e+00> : vector<2x96xf32>
    %156 = tpu.matmul %153, %27, %cst_43 {dimension_numbers = #tpu.dot_dimension_numbers<[1], [0], [0], [1], [0, 0, 1, 1], [], []>} : vector<2x32xf32>, vector<32x96xf32>, vector<2x96xf32> -> vector<2x96xf32>
    %157 = vector.broadcast %26 : vector<1x96xf32> to vector<2x96xf32>
    %158 = arith.addf %156, %157 : vector<2x96xf32>
    %159 = vector.extract_strided_slice %155 {offsets = [0, 0], sizes = [2, 32], strides = [1, 1]} : vector<2x96xf32> to vector<2x32xf32>
    %160 = vector.extract_strided_slice %158 {offsets = [0, 0], sizes = [2, 32], strides = [1, 1]} : vector<2x96xf32> to vector<2x32xf32>
    %161 = arith.addf %159, %160 : vector<2x32xf32>
    %162 = arith.negf %161 : vector<2x32xf32>
    %163 = math.exp %162 : vector<2x32xf32>
    %cst_44 = arith.constant 1.000000e+00 : f32
    %164 = vector.broadcast %cst_44 : f32 to vector<2x32xf32>
    %165 = arith.addf %164, %163 : vector<2x32xf32>
    %166 = arith.divf %164, %165 : vector<2x32xf32>
    %167 = vector.extract_strided_slice %155 {offsets = [0, 32], sizes = [2, 32], strides = [1, 1]} : vector<2x96xf32> to vector<2x32xf32>
    %168 = vector.extract_strided_slice %158 {offsets = [0, 32], sizes = [2, 32], strides = [1, 1]} : vector<2x96xf32> to vector<2x32xf32>
    %169 = arith.addf %167, %168 : vector<2x32xf32>
    %170 = arith.negf %169 : vector<2x32xf32>
    %171 = math.exp %170 : vector<2x32xf32>
    %cst_45 = arith.constant 1.000000e+00 : f32
    %172 = vector.broadcast %cst_45 : f32 to vector<2x32xf32>
    %173 = arith.addf %172, %171 : vector<2x32xf32>
    %174 = arith.divf %172, %173 : vector<2x32xf32>
    %175 = vector.extract_strided_slice %155 {offsets = [0, 64], sizes = [2, 32], strides = [1, 1]} : vector<2x96xf32> to vector<2x32xf32>
    %176 = vector.extract_strided_slice %158 {offsets = [0, 64], sizes = [2, 32], strides = [1, 1]} : vector<2x96xf32> to vector<2x32xf32>
    %177 = arith.mulf %166, %176 : vector<2x32xf32>
    %178 = arith.addf %175, %177 : vector<2x32xf32>
    %179 = math.tanh %178 : vector<2x32xf32>
    %cst_46 = arith.constant 1.000000e+00 : f32
    %180 = vector.broadcast %cst_46 : f32 to vector<2x32xf32>
    %181 = arith.subf %180, %174 : vector<2x32xf32>
    %182 = arith.mulf %181, %179 : vector<2x32xf32>
    %183 = arith.mulf %174, %153 : vector<2x32xf32>
    %184 = arith.addf %182, %183 : vector<2x32xf32>
    %185 = vector.extract_strided_slice %25 {offsets = [0, 5, 0], sizes = [2, 1, 96], strides = [1, 1, 1]} : vector<2x8x96xf32> to vector<2x1x96xf32>
    %186 = vector.shape_cast %185 : vector<2x1x96xf32> to vector<2x96xf32>
    %cst_47 = arith.constant dense<0.000000e+00> : vector<2x96xf32>
    %187 = tpu.matmul %184, %27, %cst_47 {dimension_numbers = #tpu.dot_dimension_numbers<[1], [0], [0], [1], [0, 0, 1, 1], [], []>} : vector<2x32xf32>, vector<32x96xf32>, vector<2x96xf32> -> vector<2x96xf32>
    %188 = vector.broadcast %26 : vector<1x96xf32> to vector<2x96xf32>
    %189 = arith.addf %187, %188 : vector<2x96xf32>
    %190 = vector.extract_strided_slice %186 {offsets = [0, 0], sizes = [2, 32], strides = [1, 1]} : vector<2x96xf32> to vector<2x32xf32>
    %191 = vector.extract_strided_slice %189 {offsets = [0, 0], sizes = [2, 32], strides = [1, 1]} : vector<2x96xf32> to vector<2x32xf32>
    %192 = arith.addf %190, %191 : vector<2x32xf32>
    %193 = arith.negf %192 : vector<2x32xf32>
    %194 = math.exp %193 : vector<2x32xf32>
    %cst_48 = arith.constant 1.000000e+00 : f32
    %195 = vector.broadcast %cst_48 : f32 to vector<2x32xf32>
    %196 = arith.addf %195, %194 : vector<2x32xf32>
    %197 = arith.divf %195, %196 : vector<2x32xf32>
    %198 = vector.extract_strided_slice %186 {offsets = [0, 32], sizes = [2, 32], strides = [1, 1]} : vector<2x96xf32> to vector<2x32xf32>
    %199 = vector.extract_strided_slice %189 {offsets = [0, 32], sizes = [2, 32], strides = [1, 1]} : vector<2x96xf32> to vector<2x32xf32>
    %200 = arith.addf %198, %199 : vector<2x32xf32>
    %201 = arith.negf %200 : vector<2x32xf32>
    %202 = math.exp %201 : vector<2x32xf32>
    %cst_49 = arith.constant 1.000000e+00 : f32
    %203 = vector.broadcast %cst_49 : f32 to vector<2x32xf32>
    %204 = arith.addf %203, %202 : vector<2x32xf32>
    %205 = arith.divf %203, %204 : vector<2x32xf32>
    %206 = vector.extract_strided_slice %186 {offsets = [0, 64], sizes = [2, 32], strides = [1, 1]} : vector<2x96xf32> to vector<2x32xf32>
    %207 = vector.extract_strided_slice %189 {offsets = [0, 64], sizes = [2, 32], strides = [1, 1]} : vector<2x96xf32> to vector<2x32xf32>
    %208 = arith.mulf %197, %207 : vector<2x32xf32>
    %209 = arith.addf %206, %208 : vector<2x32xf32>
    %210 = math.tanh %209 : vector<2x32xf32>
    %cst_50 = arith.constant 1.000000e+00 : f32
    %211 = vector.broadcast %cst_50 : f32 to vector<2x32xf32>
    %212 = arith.subf %211, %205 : vector<2x32xf32>
    %213 = arith.mulf %212, %210 : vector<2x32xf32>
    %214 = arith.mulf %205, %184 : vector<2x32xf32>
    %215 = arith.addf %213, %214 : vector<2x32xf32>
    %216 = vector.extract_strided_slice %25 {offsets = [0, 6, 0], sizes = [2, 1, 96], strides = [1, 1, 1]} : vector<2x8x96xf32> to vector<2x1x96xf32>
    %217 = vector.shape_cast %216 : vector<2x1x96xf32> to vector<2x96xf32>
    %cst_51 = arith.constant dense<0.000000e+00> : vector<2x96xf32>
    %218 = tpu.matmul %215, %27, %cst_51 {dimension_numbers = #tpu.dot_dimension_numbers<[1], [0], [0], [1], [0, 0, 1, 1], [], []>} : vector<2x32xf32>, vector<32x96xf32>, vector<2x96xf32> -> vector<2x96xf32>
    %219 = vector.broadcast %26 : vector<1x96xf32> to vector<2x96xf32>
    %220 = arith.addf %218, %219 : vector<2x96xf32>
    %221 = vector.extract_strided_slice %217 {offsets = [0, 0], sizes = [2, 32], strides = [1, 1]} : vector<2x96xf32> to vector<2x32xf32>
    %222 = vector.extract_strided_slice %220 {offsets = [0, 0], sizes = [2, 32], strides = [1, 1]} : vector<2x96xf32> to vector<2x32xf32>
    %223 = arith.addf %221, %222 : vector<2x32xf32>
    %224 = arith.negf %223 : vector<2x32xf32>
    %225 = math.exp %224 : vector<2x32xf32>
    %cst_52 = arith.constant 1.000000e+00 : f32
    %226 = vector.broadcast %cst_52 : f32 to vector<2x32xf32>
    %227 = arith.addf %226, %225 : vector<2x32xf32>
    %228 = arith.divf %226, %227 : vector<2x32xf32>
    %229 = vector.extract_strided_slice %217 {offsets = [0, 32], sizes = [2, 32], strides = [1, 1]} : vector<2x96xf32> to vector<2x32xf32>
    %230 = vector.extract_strided_slice %220 {offsets = [0, 32], sizes = [2, 32], strides = [1, 1]} : vector<2x96xf32> to vector<2x32xf32>
    %231 = arith.addf %229, %230 : vector<2x32xf32>
    %232 = arith.negf %231 : vector<2x32xf32>
    %233 = math.exp %232 : vector<2x32xf32>
    %cst_53 = arith.constant 1.000000e+00 : f32
    %234 = vector.broadcast %cst_53 : f32 to vector<2x32xf32>
    %235 = arith.addf %234, %233 : vector<2x32xf32>
    %236 = arith.divf %234, %235 : vector<2x32xf32>
    %237 = vector.extract_strided_slice %217 {offsets = [0, 64], sizes = [2, 32], strides = [1, 1]} : vector<2x96xf32> to vector<2x32xf32>
    %238 = vector.extract_strided_slice %220 {offsets = [0, 64], sizes = [2, 32], strides = [1, 1]} : vector<2x96xf32> to vector<2x32xf32>
    %239 = arith.mulf %228, %238 : vector<2x32xf32>
    %240 = arith.addf %237, %239 : vector<2x32xf32>
    %241 = math.tanh %240 : vector<2x32xf32>
    %cst_54 = arith.constant 1.000000e+00 : f32
    %242 = vector.broadcast %cst_54 : f32 to vector<2x32xf32>
    %243 = arith.subf %242, %236 : vector<2x32xf32>
    %244 = arith.mulf %243, %241 : vector<2x32xf32>
    %245 = arith.mulf %236, %215 : vector<2x32xf32>
    %246 = arith.addf %244, %245 : vector<2x32xf32>
    %247 = vector.extract_strided_slice %25 {offsets = [0, 7, 0], sizes = [2, 1, 96], strides = [1, 1, 1]} : vector<2x8x96xf32> to vector<2x1x96xf32>
    %248 = vector.shape_cast %247 : vector<2x1x96xf32> to vector<2x96xf32>
    %cst_55 = arith.constant dense<0.000000e+00> : vector<2x96xf32>
    %249 = tpu.matmul %246, %27, %cst_55 {dimension_numbers = #tpu.dot_dimension_numbers<[1], [0], [0], [1], [0, 0, 1, 1], [], []>} : vector<2x32xf32>, vector<32x96xf32>, vector<2x96xf32> -> vector<2x96xf32>
    %250 = vector.broadcast %26 : vector<1x96xf32> to vector<2x96xf32>
    %251 = arith.addf %249, %250 : vector<2x96xf32>
    %252 = vector.extract_strided_slice %248 {offsets = [0, 0], sizes = [2, 32], strides = [1, 1]} : vector<2x96xf32> to vector<2x32xf32>
    %253 = vector.extract_strided_slice %251 {offsets = [0, 0], sizes = [2, 32], strides = [1, 1]} : vector<2x96xf32> to vector<2x32xf32>
    %254 = arith.addf %252, %253 : vector<2x32xf32>
    %255 = arith.negf %254 : vector<2x32xf32>
    %256 = math.exp %255 : vector<2x32xf32>
    %cst_56 = arith.constant 1.000000e+00 : f32
    %257 = vector.broadcast %cst_56 : f32 to vector<2x32xf32>
    %258 = arith.addf %257, %256 : vector<2x32xf32>
    %259 = arith.divf %257, %258 : vector<2x32xf32>
    %260 = vector.extract_strided_slice %248 {offsets = [0, 32], sizes = [2, 32], strides = [1, 1]} : vector<2x96xf32> to vector<2x32xf32>
    %261 = vector.extract_strided_slice %251 {offsets = [0, 32], sizes = [2, 32], strides = [1, 1]} : vector<2x96xf32> to vector<2x32xf32>
    %262 = arith.addf %260, %261 : vector<2x32xf32>
    %263 = arith.negf %262 : vector<2x32xf32>
    %264 = math.exp %263 : vector<2x32xf32>
    %cst_57 = arith.constant 1.000000e+00 : f32
    %265 = vector.broadcast %cst_57 : f32 to vector<2x32xf32>
    %266 = arith.addf %265, %264 : vector<2x32xf32>
    %267 = arith.divf %265, %266 : vector<2x32xf32>
    %268 = vector.extract_strided_slice %248 {offsets = [0, 64], sizes = [2, 32], strides = [1, 1]} : vector<2x96xf32> to vector<2x32xf32>
    %269 = vector.extract_strided_slice %251 {offsets = [0, 64], sizes = [2, 32], strides = [1, 1]} : vector<2x96xf32> to vector<2x32xf32>
    %270 = arith.mulf %259, %269 : vector<2x32xf32>
    %271 = arith.addf %268, %270 : vector<2x32xf32>
    %272 = math.tanh %271 : vector<2x32xf32>
    %cst_58 = arith.constant 1.000000e+00 : f32
    %273 = vector.broadcast %cst_58 : f32 to vector<2x32xf32>
    %274 = arith.subf %273, %267 : vector<2x32xf32>
    %275 = arith.mulf %274, %272 : vector<2x32xf32>
    %276 = arith.mulf %267, %246 : vector<2x32xf32>
    %277 = arith.addf %275, %276 : vector<2x32xf32>
    %c0_59 = arith.constant 0 : index
    %c0_60 = arith.constant 0 : index
    %278 = vector.load %arg9[%c0_59, %c0_60] : memref<32x32xf32, #tpu.memory_space<vmem>>, vector<32x32xf32>
    %cst_61 = arith.constant dense<0.000000e+00> : vector<2x32xf32>
    %279 = tpu.matmul %277, %278, %cst_61 {dimension_numbers = #tpu.dot_dimension_numbers<[1], [0], [0], [1], [0, 0, 1, 1], [], []>} : vector<2x32xf32>, vector<32x32xf32>, vector<2x32xf32> -> vector<2x32xf32>
    %c0_62 = arith.constant 0 : index
    %c0_63 = arith.constant 0 : index
    %280 = vector.load %arg10[%c0_62, %c0_63] : memref<1x32xf32, #tpu.memory_space<vmem>>, vector<1x32xf32>
    %281 = vector.broadcast %280 : vector<1x32xf32> to vector<2x32xf32>
    %282 = arith.addf %279, %281 : vector<2x32xf32>
    %cst_64 = arith.constant 0.000000e+00 : f32
    %283 = vector.broadcast %cst_64 : f32 to vector<2x32xf32>
    %284 = arith.maximumf %282, %283 : vector<2x32xf32>
    %c0_65 = arith.constant 0 : index
    %c0_66 = arith.constant 0 : index
    %285 = vector.load %arg11[%c0_65, %c0_66] : memref<32x8xf32, #tpu.memory_space<vmem>>, vector<32x8xf32>
    %cst_67 = arith.constant dense<0.000000e+00> : vector<2x8xf32>
    %286 = tpu.matmul %284, %285, %cst_67 {dimension_numbers = #tpu.dot_dimension_numbers<[1], [0], [0], [1], [0, 0, 1, 1], [], []>} : vector<2x32xf32>, vector<32x8xf32>, vector<2x8xf32> -> vector<2x8xf32>
    %c0_68 = arith.constant 0 : index
    %c0_69 = arith.constant 0 : index
    %287 = vector.load %arg12[%c0_68, %c0_69] : memref<1x8xf32, #tpu.memory_space<vmem>>, vector<1x8xf32>
    %288 = vector.broadcast %287 : vector<1x8xf32> to vector<2x8xf32>
    %289 = arith.addf %286, %288 : vector<2x8xf32>
    %c0_70 = arith.constant 0 : index
    %c0_71 = arith.constant 0 : index
    %c0_72 = arith.constant 0 : index
    %290 = vector.load %arg13[%c0_70, %c0_71, %c0_72] : memref<2x1x8xf32, #tpu.memory_space<vmem>>, vector<2x1x8xf32>
    %291 = vector.shape_cast %290 : vector<2x1x8xf32> to vector<2x8xf32>
    %292 = vector.shape_cast %289 : vector<2x8xf32> to vector<2x1x8xf32>
    tpu.vector_store %arg13[%c0_70, %c0_71, %c0_72], %292 {strides = array<i32>} : memref<2x1x8xf32, #tpu.memory_space<vmem>>, vector<2x1x8xf32>,
    %c0_73 = arith.constant 0 : index
    %c0_74 = arith.constant 0 : index
    %c0_75 = arith.constant 0 : index
    %293 = vector.load %arg14[%c0_73, %c0_74, %c0_75] : memref<2x1x32xf32, #tpu.memory_space<vmem>>, vector<2x1x32xf32>
    %294 = vector.shape_cast %293 : vector<2x1x32xf32> to vector<2x32xf32>
    %295 = vector.shape_cast %277 : vector<2x32xf32> to vector<2x1x32xf32>
    tpu.vector_store %arg14[%c0_73, %c0_74, %c0_75], %295 {strides = array<i32>} : memref<2x1x32xf32, #tpu.memory_space<vmem>>, vector<2x1x32xf32>,
    return
  }
}

</mosaic_0001>

<bundles_post_ra>
// kernel: deep_recurrent_forward.1
= control target key start
LH: loop header
LB: loop body
LE: loop exit
PB: predicated region body
PF: predicated region fallthrough
CT: control target
= control target key end

     0   :  { %20 = vsyncpa [#allocation3], 0  ;;  %s2757_s0 = inlined_call_operand.vmem [shape: f32[2,8,4], index: 0, kind: input, shape index: {}]   ;;  %s2758_s1 = inlined_call_operand.hbm [shape: f32[2,1,32], index: 1, kind: input, shape index: {}, may-alias: {1,14}]   ;;  %s2759_s2 = inlined_call_operand.vmem [shape: f32[2,4], index: 2, kind: input, shape index: {}]   ;;  %s2760_s3 = inlined_call_operand.vmem [shape: f32[4,32], index: 3, kind: input, shape index: {}]   ;;  %s2761_s4 = inlined_call_operand.vmem [shape: f32[32,32], index: 4, kind: input, shape index: {}]   ;;  %s2762_s5 = inlined_call_operand.vmem [shape: f32[2,32], index: 5, kind: input, shape index: {}]   ;;  %s2763_s6 = inlined_call_operand.vmem [shape: f32[32,96], index: 6, kind: input, shape index: {}]   ;;  %s2764_s7 = inlined_call_operand.hbm [shape: f32[32,96], index: 7, kind: input, shape index: {}]   ;;  %s2765_s8 = inlined_call_operand.vmem [shape: f32[2,96], index: 8, kind: input, shape index: {}]   ;;  %s2766_s9 = inlined_call_operand.hbm [shape: f32[32,32], index: 9, kind: input, shape index: {}]   ;;  %s2767_s10 = inlined_call_operand.vmem [shape: f32[1,32], index: 10, kind: input, shape index: {}]   ;;  %s2768_s11 = inlined_call_operand.vmem [shape: f32[32,8], index: 11, kind: input, shape index: {}]   ;;  %s2769_s12 = inlined_call_operand.vmem [shape: f32[1,8], index: 12, kind: input, shape index: {}]   ;;  %s2770_s13 = inlined_call_operand.hbm [shape: f32[2,1,8], index: 13, kind: output, shape index: {0}]   ;;  %s2771_s14 = inlined_call_operand.hbm [shape: f32[2,1,32], index: 14, kind: output, shape index: {1}, may-alias: {1,14}]  }
   0x1   :  { %21 = vsyncpa [#allocation6], 0 }
   0x2   :  { %22 = vsyncpa [#allocation4], 0 }
   0x3   :  { %23 = vsyncpa [#allocation10], 0  ;;  %s2309_s29 = smov [#allocation5]   ;;  %s2191_s17 = scalar_lea.hbm %s2764_s7, 512 }
   0x4   :  { %s53_s30 = sshll.u32 %s2309_s29, 4  ;;  %p2192_p0 = scmp.ne.s32.totalorder %s2764_s7, %s2191_s17  ;;  %s54_s30 = int_to_ptr.vmem [resolvable:$true] %s53_s30 }
   0x5   :  { %p2195_p1 = scmp.lt.u32.totalorder %s2191_s17, %s2764_s7 }
   0x7   :  { %p2197_p2 = pnand %p2195_p1, %p2192_p0 }
   0x9   :  { %2200 = shalt.err (!%p2197_p2)
}
   0xa   :  { %s2201_s22 = scalar_lea.vmem %s54_s30, 512  ;;  %p2206_p4 = scmp.lt.s32.totalorder %s54_s30, %s54_s30 }
   0xb   :  { %p2202_p3 = scmp.ne.s32.totalorder %s54_s30, %s2201_s22  ;;  %p2207_p5 = scmp.lt.s32.totalorder %s2201_s22, %s2201_s22 }
   0xd   :  { %p2208_p6 = por %p2207_p5, %p2206_p4 }
   0xf   :  { %p2209_p7 = pnand %p2208_p6, %p2202_p3 }
  0x11   :  { %2212 = shalt.err (!%p2209_p7)
}
  0x12   :  { %s2310_s23 = smov 128   ;;  %s2311_s24 = smov 8  }
  0x13   :  { %59 = dma.hbm_to_vmem [thread:$0]  %s2764_s7, 512, %s54_s30, [#allocation6], %s2310_s23, %s2310_s23, %s2311_s24  }
  0x14   :  { %s2312_s27 = smov [#allocation2]   ;;  %s2213_s16 = scalar_lea.hbm %s2758_s1, 32 }
  0x15   :  { %s31_s28 = sshll.u32 %s2312_s27, 4  ;;  %p2214_p8 = scmp.ne.s32.totalorder %s2758_s1, %s2213_s16  ;;  %s32_s28 = int_to_ptr.vmem [resolvable:$true] %s31_s28 }
  0x16   :  { %p2217_p9 = scmp.lt.u32.totalorder %s2213_s16, %s2758_s1 }
  0x18   :  { %p2219_p10 = pnand %p2217_p9, %p2214_p8 }
  0x1a   :  { %2222 = shalt.err (!%p2219_p10)
}
  0x1b   :  { %s2223_s21 = scalar_lea.vmem %s32_s28, 32  ;;  %p2228_p12 = scmp.lt.s32.totalorder %s32_s28, %s32_s28 }
  0x1c   :  { %p2224_p11 = scmp.ne.s32.totalorder %s32_s28, %s2223_s21  ;;  %p2229_p13 = scmp.lt.s32.totalorder %s2223_s21, %s2223_s21 }
  0x1e   :  { %p2230_p0 = por %p2229_p13, %p2228_p12 }
  0x20   :  { %p2231_p1 = pnand %p2230_p0, %p2224_p11 }
  0x22   :  { %2234 = shalt.err (!%p2231_p1)
}
  0x23   :  { %s2313_s7 = smov 16   ;;  %s2314_s30 = smov 1  }
  0x24   :  { %37 = dma.hbm_to_vmem [thread:$0]  %s2758_s1, 32, %s32_s28, [#allocation3], %s2313_s7, %s2313_s7, %s2314_s30  }
  0x25   :  { %s2315_s26 = smov [#allocation7]   ;;  %s2235_s16 = scalar_lea.hbm %s2766_s9, 512 }
  0x26   :  { %s67_s27 = sshll.u32 %s2315_s26, 4  ;;  %p2236_p2 = scmp.ne.s32.totalorder %s2766_s9, %s2235_s16  ;;  %s68_s27 = int_to_ptr.vmem [resolvable:$true] %s67_s27 }
  0x27   :  { %p2239_p3 = scmp.lt.u32.totalorder %s2235_s16, %s2766_s9 }
  0x29   :  { %p2241_p4 = pnand %p2239_p3, %p2236_p2 }
  0x2b   :  { %2244 = shalt.err (!%p2241_p4)
}
  0x2c   :  { %s2245_s21 = scalar_lea.vmem %s68_s27, 512  ;;  %p2250_p6 = scmp.lt.s32.totalorder %s68_s27, %s68_s27 }
  0x2d   :  { %p2246_p5 = scmp.ne.s32.totalorder %s68_s27, %s2245_s21  ;;  %p2251_p7 = scmp.lt.s32.totalorder %s2245_s21, %s2245_s21 }
  0x2f   :  { %p2252_p8 = por %p2251_p7, %p2250_p6 }
  0x31   :  { %p2253_p9 = pnand %p2252_p8, %p2246_p5 }
  0x33   :  { %2256 = shalt.err (!%p2253_p9)
}
  0x34   :  { %73 = dma.hbm_to_vmem [thread:$0]  %s2766_s9, 512, %s68_s27, [#allocation6], %s2310_s23, %s2310_s23, %s2311_s24  }
  0x35   :  { %2301 = dma.done.wait [#allocation3], 32  }
  0x36   :  { %2302 = vsyncadd [#allocation3], 4294967264 }
  0x37   :  { %2303 = dma.done.wait [#allocation6], 1024  }
  0x38   :  { %2304 = vsyncadd [#allocation6], 4294966272  ;;  %vm119_vm0 = vcmask 1043456   ;;  %v106_v0 = vld [vmem:[%s2760_s3] sm:$0xf]  ;;  %v201_v3 = vld [vmem:[%s2761_s4 + $0x8] sm:$0xff]  ;;  %v398_v22 = vlaneseq }
  0x39   :  { %1864 = vmatprep.subr.msk.mxu0 %vm119_vm0, %v106_v0  ;;  %v1759_v1 = vld [vmem:[%s2759_s2 + $0x1] ss:$0 sm:$0xff]  ;;  %v90_v6 = vld [vmem:[%s2757_s0 + $0x8] sm:$0xff]  ;;  %v1758_v7 = vld [vmem:[%s2759_s2] ss:$0 sm:$0xff]  ;;  %vm112_vm1 = vcmask 31744  }
  0x3a   :  { %v200_v2 = vld [vmem:[%s2761_s4] sm:$0xff]  ;;  %1865 = vmatpush3.msk.msra.mxu0 %vm119_vm0, %v106_v0  ;;  %2093 = vrcp.f32 %v1759_v1  ;;  %v98_v9 = vsub.f32 %v90_v6, %v1758_v7  ;;  %v202_v13 = vld [vmem:[%s2761_s4 + $0x10] sm:$0xff]  ;;  %v203_v14 = vld [vmem:[%s2761_s4 + $0x18] sm:$0xff]  ;;  %v2316_v16 = vmov 0.0|0.0   ;;  %v2317_v20 = vmov 1966171168  }
  0x3b   :  { %v2001_v4 = vpack.c.bf16 %v201_v3, %v200_v2  ;;  %v89_v5 = vld [vmem:[%s2757_s0] sm:$0xff]  ;;  %v2005_v15 = vpack.c.bf16 %v203_v14, %v202_v13  ;;  %v292_v18 = vld [vmem:[%s2763_s6 + $0x8] sm:$0xff]  ;;  %v396_v21 = vunpack.c.l.s4 %v2317_v20  ;;  %v2482_v25 = vshrl.u32 %v398_v22, 7  ;;  %v384_v39 = vld [vmem:[#allocation5 + $0x10] sm:$0xff]  ;;  %s2322_s18 = smov 96   ;;  %s2323_s26 = smov [#allocation9]  }
  0x3c   :  { %v97_v8 = vsub.f32 %v89_v5, %v1758_v7  ;;  %v291_v17 = vld [vmem:[%s2763_s6] sm:$0xff]  ;;  %v383_v32 = vld [vmem:[#allocation5 + $0x8] sm:$0xff]  ;;  %vm209_vm2 = vcmask 261120   ;;  %vm2318_vm3 = vmmov 0   ;;  %v2319_v43 = vmov 0.0   ;;  %v294_v46 = vld [vmem:[%s2763_s6 + $0x18] sm:$0xff] }
  0x3d   :  { %2002 = vmatprep.subr.bf16.mxu1 %v2001_v4  ;;  %v2009_v19 = vpack.c.bf16 %v292_v18, %v291_v17  ;;  %v1760_v23 = vld [vmem:[%s2762_s5] ss:$0 sm:$0xff]  ;;  %v397_v24 = vunpack.c.0.s8 %v396_v21  ;;  %v2486_v28 = vld [vmem:[#allocation2 + $0x1] sm:$0x1]  ;;  %v382_v31 = vld [vmem:[#allocation5] sm:$0xff]  ;;  %vm552_vm4 = vcmask 1041409  }
  0x3e   :  { %2004 = vmatpush3.bf16.msra.mxu1 %v2001_v4  ;;  %v2484_v27 = vld [vmem:[#allocation2] sm:$0x1]  ;;  %v2493_v37 = vpack.c.bf16 %v383_v32, %v382_v31  ;;  %v293_v45 = vld [vmem:[%s2763_s6 + $0x10] sm:$0xff]  ;;  %v1764_v48 = vld [vmem:[%s2762_s5 + $0x1] ss:$0 sm:$0xff]  ;;  %s2320_s5 = smov 64  }
  0x3f   :  { %2006 = vmatprep.subr.bf16.mxu1 %v2005_v15  ;;  %2010 = vmatprep.subr.bf16.mxu0 %v2009_v19  ;;  %v394_v34 = vcombine.low %v2484_v27, %v2486_v28  ;;  %v2491_v35 = vsub.s32 %v397_v24, %v2482_v25  ;;  %v385_v40 = vld [vmem:[#allocation5 + $0x18] sm:$0xff]  ;;  %v2013_v47 = vpack.c.bf16 %v294_v46, %v293_v45  ;;  %vm1721_vm5 = vcmask 261127   ;;  %s1741_s29 = sshll.u32 %s2323_s26, 4  ;;  %s1742_s29 = int_to_ptr.vmem [resolvable:$true] %s1741_s29 }
  0x40   :  { %v2499_v42 = vpack.c.bf16 %v385_v40, %v384_v39  ;;  %v2529_v53 = vld [vmem:[%s2765_s8 + $0x1] ss:$0 sm:$0xff]  ;;  %v1767_v58 = vld [vmem:[%s2765_s8] ss:$0 sm:$0xff]  ;;  %s2321_s8 = smov 32   ;;  %s2257_s15 = scalar_lea.vmem %s1742_s29, 32 }
  0x41   :  { %v401_v41 = vrot.slane %v394_v34, %v2491_v35  ;;  %p2258_p10 = scmp.ne.s32.totalorder %s1742_s29, %s2257_s15  ;;  %p2262_p11 = scmp.lt.s32.totalorder %s1742_s29, %s1742_s29 }
  0x42   :  { %2008 = vmatpush3.bf16.msra.mxu1 %v2005_v15  ;;  %p2263_p12 = scmp.lt.s32.totalorder %s2257_s15, %s2257_s15 }
  0x43   :  { %2017 = vmatprep.subr.bf16.mxu1 %v2316_v16  ;;  %v408_v44 = vrot.slane %v401_v41, %v2491_v35 }
  0x44   :  { %v2094_v10 = vpop.eup %2093  ;;  %p2264_p13 = por %p2263_p12, %p2262_p11 }
  0x45   :  { %v104_v11 = vmul.f32 %v2094_v10, %v97_v8  ;;  %v105_v12 = vmul.f32 %v2094_v10, %v98_v9 }
  0x46   :  { %p2265_p0 = pnand %p2264_p13, %p2258_p10 }
  0x47   :  { %1866 = vmatprep.mubr.msk.f32.mxu0 %vm112_vm1, %v104_v11  ;;  %v533_v11 = vsub.s32 0, %v2482_v25 }
  0x48   :  { %1867 = vmatmul.mubr.msk.f32.vlgmr.msra.gmra.mrb[0].mxu0 %vm112_vm1, %v105_v12 }
  0x49   :  { %2012 = vmatpush3.bf16.msra.mxu0 %v2009_v19  ;;  %v538_v14 = vrot.slane %v2486_v28, %v533_v11  ;;  %v534_v15 = vrot.slane %v2484_v27, %v533_v11 }
  0x4a   :  { %2014 = vmatprep.subr.bf16.mxu0 %v2013_v47 }
  0x4d   :  { %2016 = vmatpush3.bf16.msra.mxu0 %v2013_v47 }
  0x4e   :  { %2023 = vmatprep.subr.bf16.mxu0 %v2316_v16 }
 0x11b   :  { %v1868_v26 = vpop.f32.mrb[0].mxu0 }
 0x11c   :  { %v195_v29 = vadd.f32 %v1868_v26, %v1760_v23  ;;  %v189_v30 = vpop.f32.mrb[1].mxu0 }
 0x11d   :  { %v190_v33 = vadd.f32 %v1760_v23, %v189_v30 }
 0x11e   :  { %v199_v38 = vmax.f32 %v195_v29, 0.0 }
 0x11f   :  { %v198_v36 = vmax.f32 %v190_v33, 0.0 }
 0x121   :  { %1877 = vmatprep.mubr.msk.f32.mxu1 %vm209_vm2, %v198_v36 }
 0x122   :  { %1878 = vmatmul.mubr.msk.f32.vlgmr.msra.gmra.mrb[0].mxu1 %vm209_vm2, %v199_v38 }
 0x123   :  { %2019 = vmatpush3.bf16.msra.mxu1 %v2493_v37  ;;  %1899 = vmatprep.mubr.msk.f32.mxu1 %vm2318_vm3, %v2319_v43 }
 0x124   :  { %2020 = vmatprep.subr.bf16.mxu1 %v2316_v16 }
 0x127   :  { %2022 = vmatpush3.bf16.msra.mxu1 %v2499_v42 }
 0x128   :  { %2029 = vmatprep.subr.bf16.mxu1 %v2316_v16 }
 0x12a   :  { %1900 = vmatmul.mubr.msk.f32.vlgmr.msra.gmra.mrb[2].mxu1 %vm209_vm2, %v408_v44 }
 0x12b   :  { %2031 = vmatpush3.bf16.msra.mxu1 %v2493_v37  ;;  %1921 = vmatprep.mubr.msk.f32.mxu1 %vm2318_vm3, %v2319_v43 }
 0x12c   :  { %2032 = vmatprep.subr.bf16.mxu1 %v2316_v16 }
 0x12f   :  { %2034 = vmatpush3.bf16.msra.mxu1 %v2499_v42 }
 0x130   :  { %2041 = vmatprep.subr.bf16.mxu1 %v2316_v16 }
 0x1f5   :  { %v1879_v49 = vpop.f32.mrb[0].mxu1 }
 0x1f6   :  { %v282_v50 = vpop.f32.mrb[1].mxu1  ;;  %v288_v52 = vadd.f32 %v1879_v49, %v1764_v48 }
 0x1f7   :  { %v283_v51 = vadd.f32 %v1764_v48, %v282_v50 }
 0x1f9   :  { %1888 = vmatprep.mubr.msk.f32.mxu0 %vm209_vm2, %v283_v51 }
 0x1fa   :  { %1889 = vmatmul.mubr.msk.f32.vlgmr.msra.gmra.mrb[2].mxu0 %vm209_vm2, %v288_v52 }
 0x1fb   :  { %2025 = vmatpush3.bf16.msra.mxu0 %v2493_v37  ;;  %1910 = vmatprep.mubr.msk.f32.mxu0 %vm2318_vm3, %v2319_v43 }
 0x1fc   :  { %2026 = vmatprep.subr.bf16.mxu0 %v2316_v16 }
 0x1fd   :  { %v477_v54 = vpop.f32.mrb[2].mxu1 }
 0x1fe   :  { %v478_v55 = vadd.f32 %v2529_v53, %v477_v54  ;;  %v1901_v56 = vpop.f32.mrb[3].mxu1 }
 0x1ff   :  { %2028 = vmatpush3.bf16.msra.mxu0 %v2499_v42 }
 0x200   :  { %v482_v57 = vrot.slane %v478_v55, 1  ;;  %2035 = vmatprep.subr.bf16.mxu0 %v2316_v16 }
 0x202   :  { %501 = vrot.lane.b32.xlu0 %v482_v57, %s2320_s5 }
 0x206   :  { %499 = vrot.lane.b32.xlu0 %v478_v55, %s2320_s5 }
 0x274   :  { %v502_v7 = vpop.permute.xlu0 %501 }
 0x278   :  { %v500_v12 = vpop.permute.xlu0 %499 }
 0x2cd   :  { %v1890_v59 = vpop.f32.mrb[2].mxu0 }
 0x2ce   :  { %v2543_v60 = vadd.f32 %v1890_v59, %v1767_v58  ;;  %v372_v61 = vpop.f32.mrb[3].mxu0 }
 0x2cf   :  { %v2545_v62 = vadd.f32 %v1767_v58, %v372_v61 }
 0x2d0   :  { %v486_v63 = vadd.f32 %v482_v57, %v2543_v60 }
 0x2d1   :  { %v485_v0 = vadd.f32 %v478_v55, %v2545_v62 }
 0x2d2   :  { %v1773_v1 = vmul.f32 -1.442695, %v486_v63 }
 0x2d3   :  { %v1772_v2 = vmul.f32 -1.442695, %v485_v0 }
 0x2d4   :  { %2095 = vpow2.f32 %v1773_v1 }
 0x2d5   :  { %2097 = vpow2.f32 %v1772_v2 }
 0x2de   :  { %v2096_v3 = vpop.eup %2095 }
 0x2df   :  { %v2098_v4 = vpop.eup %2097  ;;  %v494_v5 = vadd.f32 1.0, %v2096_v3 }
 0x2e0   :  { %v493_v6 = vadd.f32 1.0, %v2098_v4 }
 0x2e1   :  { %2099 = vrcp.f32 %v494_v5 }
 0x2e2   :  { %2101 = vrcp.f32 %v493_v6 }
 0x2eb   :  { %v2100_v8 = vpop.eup %2099 }
 0x2ec   :  { %v506_v9 = vmul.f32 %v2100_v8, %v502_v7  ;;  %v2102_v10 = vpop.eup %2101  ;;  %v520_v24 = vsub.f32 1.0, %v2100_v8 }
 0x2ed   :  { %v505_v13 = vmul.f32 %v2102_v10, %v500_v12  ;;  %v519_v30 = vsub.f32 1.0, %v2102_v10 }
 0x2ee   :  { %511 = vrot.lane.b32.xlu1 %v506_v9, %s2320_s5 }
 0x2f2   :  { %509 = vrot.lane.b32.xlu1 %v505_v13, %s2320_s5 }
 0x2f6   :  { %541 = vrot.lane.b32.xlu1 %v538_v14, %s2321_s8 }
 0x2fa   :  { %539 = vrot.lane.b32.xlu1 %v534_v15, %s2321_s8 }
 0x360   :  { %v512_v17 = vpop.permute.xlu1 %511 }
 0x361   :  { %v516_v18 = vadd.f32 %v512_v17, %v2543_v60 }
 0x363   :  { %2103 = vtanh.f32 %v516_v18 }
 0x364   :  { %v510_v19 = vpop.permute.xlu1 %509 }
 0x365   :  { %v515_v20 = vadd.f32 %v510_v19, %v2545_v62 }
 0x367   :  { %2105 = vtanh.f32 %v515_v20 }
 0x368   :  { %v542_v23 = vpop.permute.xlu1 %541 }
 0x369   :  { %v546_v26 = vmul.f32 %v2100_v8, %v542_v23 }
 0x36c   :  { %v540_v28 = vpop.permute.xlu1 %539 }
 0x36d   :  { %v2104_v21 = vpop.eup %2103  ;;  %v545_v32 = vmul.f32 %v2102_v10, %v540_v28 }
 0x36e   :  { %525 = vrot.lane.b32.xlu0 %v2104_v21, %s2322_s18 }
 0x371   :  { %v2106_v22 = vpop.eup %2105 }
 0x372   :  { %523 = vrot.lane.b32.xlu0 %v2106_v22, %s2322_s18 }
 0x3e0   :  { %v526_v25 = vpop.permute.xlu0 %525 }
 0x3e1   :  { %v530_v27 = vmul.f32 %v526_v25, %v520_v24 }
 0x3e3   :  { %v548_v29 = vadd.f32 %v546_v26, %v530_v27 }
 0x3e4   :  { %v524_v31 = vpop.permute.xlu0 %523 }
 0x3e5   :  { %v529_v33 = vmul.f32 %v524_v31, %v519_v30  ;;  %v551_v34 = vrot.slane %v548_v29, 7 }
 0x3e7   :  { %v547_v36 = vadd.f32 %v545_v32, %v529_v33 }
 0x3e9   :  { %v553_v38 = vsel %vm552_vm4, %v551_v34, %v547_v36  ;;  %v678_v6 = vrot.slane %v547_v36, 7 }
 0x3ea   :  { %554 = vrot.lane.b32.xlu0 %v553_v38, %s2322_s18 }
 0x45c   :  { %v555_v39 = vpop.permute.xlu0 %554 }
 0x45d   :  { %1911 = vmatmul.mubr.msk.f32.vlgmr.msra.gmra.mrb[4].mxu0 %vm209_vm2, %v555_v39 }
 0x45e   :  { %2037 = vmatpush3.bf16.msra.mxu0 %v2493_v37  ;;  %1932 = vmatprep.mubr.msk.f32.mxu0 %vm2318_vm3, %v2319_v43 }
 0x45f   :  { %2038 = vmatprep.subr.bf16.mxu0 %v2316_v16 }
 0x462   :  { %2040 = vmatpush3.bf16.msra.mxu0 %v2499_v42 }
 0x463   :  { %2047 = vmatprep.subr.bf16.mxu0 %v2316_v16 }
 0x530   :  { %v624_v40 = vpop.f32.mrb[4].mxu0 }
 0x531   :  { %v625_v41 = vadd.f32 %v2529_v53, %v624_v40  ;;  %v1912_v44 = vpop.f32.mrb[5].mxu0 }
 0x533   :  { %648 = vrot.lane.b32.xlu0 %v625_v41, %s2320_s5  ;;  %v629_v45 = vrot.slane %v625_v41, 7  ;;  %v633_v46 = vadd.f32 %v625_v41, %v2543_v60 }
 0x535   :  { %646 = vrot.lane.b32.xlu1 %v629_v45, %s2320_s5  ;;  %v632_v47 = vadd.f32 %v629_v45, %v2545_v62  ;;  %v1776_v48 = vmul.f32 -1.442695, %v633_v46 }
 0x537   :  { %v1775_v49 = vmul.f32 -1.442695, %v632_v47  ;;  %2107 = vpow2.f32 %v1776_v48 }
 0x539   :  { %2109 = vpow2.f32 %v1775_v49 }
 0x541   :  { %v2108_v50 = vpop.eup %2107 }
 0x542   :  { %v641_v52 = vadd.f32 1.0, %v2108_v50 }
 0x543   :  { %v2110_v51 = vpop.eup %2109 }
 0x544   :  { %v640_v54 = vadd.f32 1.0, %v2110_v51  ;;  %2111 = vrcp.f32 %v641_v52 }
 0x546   :  { %2113 = vrcp.f32 %v640_v54 }
 0x54e   :  { %v2112_v55 = vpop.eup %2111 }
 0x54f   :  { %v667_v7 = vsub.f32 1.0, %v2112_v55  ;;  %v682_v13 = vmul.f32 %v2112_v55, %v551_v34 }
 0x550   :  { %v2114_v58 = vpop.eup %2113 }
 0x551   :  { %v666_v8 = vsub.f32 1.0, %v2114_v58  ;;  %v681_v11 = vmul.f32 %v2114_v58, %v678_v6 }
 0x5a5   :  { %v649_v56 = vpop.permute.xlu0 %648 }
 0x5a6   :  { %v653_v57 = vmul.f32 %v2112_v55, %v649_v56 }
 0x5a7   :  { %v647_v59 = vpop.permute.xlu1 %646 }
 0x5a8   :  { %v652_v61 = vmul.f32 %v2114_v58, %v647_v59  ;;  %658 = vrot.lane.b32.xlu0 %v653_v57, %s2320_s5 }
 0x5aa   :  { %656 = vrot.lane.b32.xlu1 %v652_v61, %s2320_s5 }
 0x61a   :  { %v659_v63 = vpop.permute.xlu0 %658 }
 0x61b   :  { %v663_v0 = vadd.f32 %v659_v63, %v2543_v60 }
 0x61c   :  { %v657_v1 = vpop.permute.xlu1 %656 }
 0x61d   :  { %2115 = vtanh.f32 %v663_v0  ;;  %v662_v2 = vadd.f32 %v657_v1, %v2545_v62 }
 0x61f   :  { %2117 = vtanh.f32 %v662_v2 }
 0x627   :  { %v2116_v3 = vpop.eup %2115 }
 0x628   :  { %672 = vrot.lane.b32.xlu0 %v2116_v3, %s2322_s18 }
 0x629   :  { %v2118_v4 = vpop.eup %2117 }
 0x62a   :  { %670 = vrot.lane.b32.xlu1 %v2118_v4, %s2322_s18 }
 0x69a   :  { %v673_v5 = vpop.permute.xlu0 %672 }
 0x69b   :  { %v677_v10 = vmul.f32 %v673_v5, %v667_v7 }
 0x69c   :  { %v671_v9 = vpop.permute.xlu1 %670 }
 0x69d   :  { %v676_v12 = vmul.f32 %v671_v9, %v666_v8  ;;  %v684_v15 = vadd.f32 %v682_v13, %v677_v10 }
 0x69f   :  { %v683_v14 = vadd.f32 %v681_v11, %v676_v12  ;;  %v815_v49 = vrot.slane %v684_v15, 7 }
 0x6a1   :  { %v687_v17 = vrot.slane %v683_v14, 1  ;;  %v814_v51 = vrot.slane %v683_v14, 7 }
 0x6a3   :  { %v688_v18 = vsel %vm552_vm4, %v684_v15, %v687_v17 }
 0x6a4   :  { %689 = vrot.lane.b32.xlu1 %v688_v18, %s2322_s18 }
 0x716   :  { %v690_v19 = vpop.permute.xlu1 %689 }
 0x717   :  { %1922 = vmatmul.mubr.msk.f32.vlgmr.msra.gmra.mrb[4].mxu1 %vm209_vm2, %v690_v19 }
 0x718   :  { %2043 = vmatpush3.bf16.msra.mxu1 %v2493_v37  ;;  %1943 = vmatprep.mubr.msk.f32.mxu1 %vm2318_vm3, %v2319_v43 }
 0x719   :  { %2044 = vmatprep.subr.bf16.mxu1 %v2316_v16 }
 0x71c   :  { %2046 = vmatpush3.bf16.msra.mxu1 %v2499_v42 }
 0x71d   :  { %2053 = vmatprep.subr.bf16.mxu1 %v2316_v16 }
 0x7ea   :  { %v759_v20 = vpop.f32.mrb[4].mxu1 }
 0x7eb   :  { %v760_v21 = vadd.f32 %v2529_v53, %v759_v20  ;;  %v1923_v22 = vpop.f32.mrb[5].mxu1 }
 0x7ed   :  { %v764_v23 = vrot.slane %v760_v21, 6  ;;  %v765_v24 = vrot.slane %v760_v21, 7 }
 0x7ef   :  { %784 = vrot.lane.b32.xlu1 %v765_v24, %s2320_s5  ;;  %782 = vrot.lane.b32.xlu0 %v764_v23, %s2320_s5  ;;  %v768_v25 = vadd.f32 %v764_v23, %v2545_v62  ;;  %v769_v26 = vadd.f32 %v765_v24, %v2543_v60 }
 0x7f1   :  { %v1778_v27 = vmul.f32 -1.442695, %v768_v25  ;;  %v1779_v28 = vmul.f32 -1.442695, %v769_v26 }
 0x7f3   :  { %2119 = vpow2.f32 %v1778_v27 }
 0x7f4   :  { %2121 = vpow2.f32 %v1779_v28 }
 0x7fd   :  { %v2120_v29 = vpop.eup %2119 }
 0x7fe   :  { %v2122_v30 = vpop.eup %2121  ;;  %v776_v31 = vadd.f32 1.0, %v2120_v29 }
 0x7ff   :  { %v777_v32 = vadd.f32 1.0, %v2122_v30 }
 0x800   :  { %2123 = vrcp.f32 %v776_v31 }
 0x801   :  { %2125 = vrcp.f32 %v777_v32 }
 0x80a   :  { %v2124_v33 = vpop.eup %2123 }
 0x80b   :  { %v2126_v34 = vpop.eup %2125  ;;  %v802_v54 = vsub.f32 1.0, %v2124_v33  ;;  %v818_v58 = vmul.f32 %v2124_v33, %v814_v51 }
 0x80c   :  { %v803_v50 = vsub.f32 1.0, %v2126_v34  ;;  %v819_v55 = vmul.f32 %v2126_v34, %v815_v49 }
 0x861   :  { %v785_v36 = vpop.permute.xlu1 %784  ;;  %v783_v38 = vpop.permute.xlu0 %782 }
 0x862   :  { %v789_v39 = vmul.f32 %v2126_v34, %v785_v36  ;;  %v788_v40 = vmul.f32 %v2124_v33, %v783_v38 }
 0x864   :  { %794 = vrot.lane.b32.xlu1 %v789_v39, %s2320_s5  ;;  %792 = vrot.lane.b32.xlu0 %v788_v40, %s2320_s5 }
 0x8d6   :  { %v795_v41 = vpop.permute.xlu1 %794  ;;  %v793_v44 = vpop.permute.xlu0 %792 }
 0x8d7   :  { %v799_v45 = vadd.f32 %v795_v41, %v2543_v60  ;;  %v798_v46 = vadd.f32 %v793_v44, %v2545_v62 }
 0x8d9   :  { %2127 = vtanh.f32 %v799_v45 }
 0x8da   :  { %2129 = vtanh.f32 %v798_v46 }
 0x8e3   :  { %v2128_v47 = vpop.eup %2127 }
 0x8e4   :  { %v2130_v48 = vpop.eup %2129  ;;  %808 = vrot.lane.b32.xlu1 %v2128_v47, %s2322_s18 }
 0x8e5   :  { %806 = vrot.lane.b32.xlu0 %v2130_v48, %s2322_s18 }
 0x956   :  { %v809_v52 = vpop.permute.xlu1 %808 }
 0x957   :  { %v813_v56 = vmul.f32 %v809_v52, %v803_v50  ;;  %v807_v57 = vpop.permute.xlu0 %806 }
 0x958   :  { %v812_v59 = vmul.f32 %v807_v57, %v802_v54 }
 0x959   :  { %v821_v61 = vadd.f32 %v819_v55, %v813_v56 }
 0x95a   :  { %v820_v63 = vadd.f32 %v818_v58, %v812_v59 }
 0x95b   :  { %v825_v0 = vrot.slane %v821_v61, 1  ;;  %v953_v30 = vrot.slane %v821_v61, 7 }
 0x95c   :  { %v824_v1 = vrot.slane %v820_v63, 2  ;;  %v952_v32 = vrot.slane %v820_v63, 7 }
 0x95e   :  { %v826_v2 = vsel %vm552_vm4, %v825_v0, %v824_v1 }
 0x95f   :  { %827 = vrot.lane.b32.xlu0 %v826_v2, %s2322_s18 }
 0x9d1   :  { %v828_v3 = vpop.permute.xlu0 %827 }
 0x9d2   :  { %1933 = vmatmul.mubr.msk.f32.vlgmr.msra.gmra.mrb[6].mxu0 %vm209_vm2, %v828_v3 }
 0x9d3   :  { %2049 = vmatpush3.bf16.msra.mxu0 %v2493_v37  ;;  %1954 = vmatprep.mubr.msk.f32.mxu0 %vm2318_vm3, %v2319_v43 }
 0x9d4   :  { %2050 = vmatprep.subr.bf16.mxu0 %v2316_v16 }
 0x9d7   :  { %2052 = vmatpush3.bf16.msra.mxu0 %v2499_v42 }
 0x9d8   :  { %2059 = vmatprep.subr.bf16.mxu0 %v2316_v16 }
 0xaa5   :  { %v897_v4 = vpop.f32.mrb[6].mxu0 }
 0xaa6   :  { %v898_v5 = vadd.f32 %v2529_v53, %v897_v4  ;;  %v1934_v6 = vpop.f32.mrb[7].mxu0 }
 0xaa8   :  { %v902_v7 = vrot.slane %v898_v5, 5  ;;  %v903_v8 = vrot.slane %v898_v5, 6 }
 0xaaa   :  { %922 = vrot.lane.b32.xlu0 %v903_v8, %s2320_s5  ;;  %920 = vrot.lane.b32.xlu1 %v902_v7, %s2320_s5  ;;  %v906_v9 = vadd.f32 %v902_v7, %v2545_v62  ;;  %v907_v10 = vadd.f32 %v903_v8, %v2543_v60 }
 0xaac   :  { %v1781_v11 = vmul.f32 -1.442695, %v906_v9  ;;  %v1782_v12 = vmul.f32 -1.442695, %v907_v10 }
 0xaae   :  { %2131 = vpow2.f32 %v1781_v11 }
 0xaaf   :  { %2133 = vpow2.f32 %v1782_v12 }
 0xab8   :  { %v2132_v13 = vpop.eup %2131 }
 0xab9   :  { %v2134_v14 = vpop.eup %2133  ;;  %v914_v15 = vadd.f32 1.0, %v2132_v13 }
 0xaba   :  { %v915_v17 = vadd.f32 1.0, %v2134_v14 }
 0xabb   :  { %2135 = vrcp.f32 %v914_v15 }
 0xabc   :  { %2137 = vrcp.f32 %v915_v17 }
 0xac5   :  { %v2136_v18 = vpop.eup %2135 }
 0xac6   :  { %v2138_v19 = vpop.eup %2137  ;;  %v940_v34 = vsub.f32 1.0, %v2136_v18  ;;  %v956_v40 = vmul.f32 %v2136_v18, %v952_v32 }
 0xac7   :  { %v941_v31 = vsub.f32 1.0, %v2138_v19  ;;  %v957_v36 = vmul.f32 %v2138_v19, %v953_v30 }
 0xb1c   :  { %v923_v20 = vpop.permute.xlu0 %922  ;;  %v921_v21 = vpop.permute.xlu1 %920 }
 0xb1d   :  { %v927_v22 = vmul.f32 %v2138_v19, %v923_v20  ;;  %v926_v23 = vmul.f32 %v2136_v18, %v921_v21 }
 0xb1f   :  { %932 = vrot.lane.b32.xlu0 %v927_v22, %s2320_s5  ;;  %930 = vrot.lane.b32.xlu1 %v926_v23, %s2320_s5 }
 0xb91   :  { %v933_v24 = vpop.permute.xlu0 %932  ;;  %v931_v25 = vpop.permute.xlu1 %930 }
 0xb92   :  { %v937_v26 = vadd.f32 %v933_v24, %v2543_v60  ;;  %v936_v27 = vadd.f32 %v931_v25, %v2545_v62 }
 0xb94   :  { %2139 = vtanh.f32 %v937_v26 }
 0xb95   :  { %2141 = vtanh.f32 %v936_v27 }
 0xb9e   :  { %v2140_v28 = vpop.eup %2139 }
 0xb9f   :  { %v2142_v29 = vpop.eup %2141  ;;  %946 = vrot.lane.b32.xlu0 %v2140_v28, %s2322_s18 }
 0xba0   :  { %944 = vrot.lane.b32.xlu1 %v2142_v29, %s2322_s18 }
 0xc11   :  { %v947_v33 = vpop.permute.xlu0 %946 }
 0xc12   :  { %v951_v38 = vmul.f32 %v947_v33, %v941_v31  ;;  %v945_v39 = vpop.permute.xlu1 %944 }
 0xc13   :  { %v950_v41 = vmul.f32 %v945_v39, %v940_v34 }
 0xc14   :  { %v959_v44 = vadd.f32 %v957_v36, %v951_v38 }
 0xc15   :  { %v958_v45 = vadd.f32 %v956_v40, %v950_v41 }
 0xc16   :  { %v963_v46 = vrot.slane %v959_v44, 2  ;;  %v1091_v14 = vrot.slane %v959_v44, 7 }
 0xc17   :  { %v962_v47 = vrot.slane %v958_v45, 3  ;;  %v1090_v17 = vrot.slane %v958_v45, 7 }
 0xc19   :  { %v964_v48 = vsel %vm552_vm4, %v963_v46, %v962_v47 }
 0xc1a   :  { %965 = vrot.lane.b32.xlu1 %v964_v48, %s2322_s18 }
 0xc8c   :  { %v966_v49 = vpop.permute.xlu1 %965 }
 0xc8d   :  { %1944 = vmatmul.mubr.msk.f32.vlgmr.msra.gmra.mrb[6].mxu1 %vm209_vm2, %v966_v49 }
 0xc8e   :  { %2055 = vmatpush3.bf16.msra.mxu1 %v2493_v37  ;;  %1965 = vmatprep.mubr.msk.f32.mxu1 %vm2318_vm3, %v2319_v43 }
 0xc8f   :  { %2056 = vmatprep.subr.bf16.mxu1 %v2316_v16 }
 0xc92   :  { %2058 = vmatpush3.bf16.msra.mxu1 %v2499_v42 }
 0xc93   :  { %2065 = vmatprep.subr.bf16.mxu1 %v2316_v16 }
 0xd60   :  { %v1035_v50 = vpop.f32.mrb[6].mxu1 }
 0xd61   :  { %v1036_v51 = vadd.f32 %v2529_v53, %v1035_v50  ;;  %v1945_v52 = vpop.f32.mrb[7].mxu1 }
 0xd63   :  { %v1040_v54 = vrot.slane %v1036_v51, 4  ;;  %v1041_v55 = vrot.slane %v1036_v51, 5 }
 0xd65   :  { %1060 = vrot.lane.b32.xlu1 %v1041_v55, %s2320_s5  ;;  %1058 = vrot.lane.b32.xlu0 %v1040_v54, %s2320_s5  ;;  %v1044_v56 = vadd.f32 %v1040_v54, %v2545_v62  ;;  %v1045_v57 = vadd.f32 %v1041_v55, %v2543_v60 }
 0xd67   :  { %v1784_v58 = vmul.f32 -1.442695, %v1044_v56  ;;  %v1785_v59 = vmul.f32 -1.442695, %v1045_v57 }
 0xd69   :  { %2143 = vpow2.f32 %v1784_v58 }
 0xd6a   :  { %2145 = vpow2.f32 %v1785_v59 }
 0xd73   :  { %v2144_v61 = vpop.eup %2143 }
 0xd74   :  { %v2146_v63 = vpop.eup %2145  ;;  %v1052_v0 = vadd.f32 1.0, %v2144_v61 }
 0xd75   :  { %v1053_v1 = vadd.f32 1.0, %v2146_v63 }
 0xd76   :  { %2147 = vrcp.f32 %v1052_v0 }
 0xd77   :  { %2149 = vrcp.f32 %v1053_v1 }
 0xd80   :  { %v2148_v2 = vpop.eup %2147 }
 0xd81   :  { %v2150_v3 = vpop.eup %2149  ;;  %v1078_v19 = vsub.f32 1.0, %v2148_v2  ;;  %v1094_v23 = vmul.f32 %v2148_v2, %v1090_v17 }
 0xd82   :  { %v1079_v15 = vsub.f32 1.0, %v2150_v3  ;;  %v1095_v20 = vmul.f32 %v2150_v3, %v1091_v14 }
 0xdd7   :  { %v1061_v4 = vpop.permute.xlu1 %1060  ;;  %v1059_v5 = vpop.permute.xlu0 %1058 }
 0xdd8   :  { %v1065_v6 = vmul.f32 %v2150_v3, %v1061_v4  ;;  %v1064_v7 = vmul.f32 %v2148_v2, %v1059_v5 }
 0xdda   :  { %1070 = vrot.lane.b32.xlu1 %v1065_v6, %s2320_s5  ;;  %1068 = vrot.lane.b32.xlu0 %v1064_v7, %s2320_s5 }
 0xe4c   :  { %v1071_v8 = vpop.permute.xlu1 %1070  ;;  %v1069_v9 = vpop.permute.xlu0 %1068 }
 0xe4d   :  { %v1075_v10 = vadd.f32 %v1071_v8, %v2543_v60  ;;  %v1074_v11 = vadd.f32 %v1069_v9, %v2545_v62 }
 0xe4f   :  { %2151 = vtanh.f32 %v1075_v10 }
 0xe50   :  { %2153 = vtanh.f32 %v1074_v11 }
 0xe59   :  { %v2152_v12 = vpop.eup %2151 }
 0xe5a   :  { %v2154_v13 = vpop.eup %2153  ;;  %1084 = vrot.lane.b32.xlu1 %v2152_v12, %s2322_s18 }
 0xe5b   :  { %1082 = vrot.lane.b32.xlu0 %v2154_v13, %s2322_s18 }
 0xecc   :  { %v1085_v18 = vpop.permute.xlu1 %1084 }
 0xecd   :  { %v1089_v21 = vmul.f32 %v1085_v18, %v1079_v15  ;;  %v1083_v22 = vpop.permute.xlu0 %1082 }
 0xece   :  { %v1088_v24 = vmul.f32 %v1083_v22, %v1078_v19 }
 0xecf   :  { %v1097_v25 = vadd.f32 %v1095_v20, %v1089_v21 }
 0xed0   :  { %v1096_v26 = vadd.f32 %v1094_v23, %v1088_v24 }
 0xed1   :  { %v1101_v27 = vrot.slane %v1097_v25, 3  ;;  %v1229_v59 = vrot.slane %v1097_v25, 7 }
 0xed2   :  { %v1100_v28 = vrot.slane %v1096_v26, 4  ;;  %v1228_v63 = vrot.slane %v1096_v26, 7 }
 0xed4   :  { %v1102_v29 = vsel %vm552_vm4, %v1101_v27, %v1100_v28 }
 0xed5   :  { %1103 = vrot.lane.b32.xlu0 %v1102_v29, %s2322_s18 }
 0xf47   :  { %v1104_v30 = vpop.permute.xlu0 %1103 }
 0xf48   :  { %1955 = vmatmul.mubr.msk.f32.vlgmr.msra.gmra.mrb[8].mxu0 %vm209_vm2, %v1104_v30 }
 0xf49   :  { %2061 = vmatpush3.bf16.msra.mxu0 %v2493_v37  ;;  %1976 = vmatprep.mubr.msk.f32.mxu0 %vm2318_vm3, %v2319_v43 }
 0xf4a   :  { %2062 = vmatprep.subr.bf16.mxu0 %v2316_v16 }
 0xf4d   :  { %2064 = vmatpush3.bf16.msra.mxu0 %v2499_v42 }
 0xf4e   :  { %2071 = vmatprep.subr.bf16.mxu0 %v2316_v16 }
0x101b   :  { %v1173_v31 = vpop.f32.mrb[8].mxu0 }
0x101c   :  { %v1174_v32 = vadd.f32 %v2529_v53, %v1173_v31  ;;  %v1956_v33 = vpop.f32.mrb[9].mxu0 }
0x101e   :  { %v1178_v34 = vrot.slane %v1174_v32, 3  ;;  %v1179_v36 = vrot.slane %v1174_v32, 4 }
0x1020   :  { %1198 = vrot.lane.b32.xlu0 %v1179_v36, %s2320_s5  ;;  %1196 = vrot.lane.b32.xlu1 %v1178_v34, %s2320_s5  ;;  %v1182_v37 = vadd.f32 %v1178_v34, %v2545_v62  ;;  %v1183_v38 = vadd.f32 %v1179_v36, %v2543_v60 }
0x1022   :  { %v1787_v39 = vmul.f32 -1.442695, %v1182_v37  ;;  %v1788_v40 = vmul.f32 -1.442695, %v1183_v38 }
0x1024   :  { %2155 = vpow2.f32 %v1787_v39 }
0x1025   :  { %2157 = vpow2.f32 %v1788_v40 }
0x102e   :  { %v2156_v42 = vpop.eup %2155 }
0x102f   :  { %v2158_v41 = vpop.eup %2157  ;;  %v1190_v44 = vadd.f32 1.0, %v2156_v42 }
0x1030   :  { %v1191_v45 = vadd.f32 1.0, %v2158_v41 }
0x1031   :  { %2159 = vrcp.f32 %v1190_v44 }
0x1032   :  { %2161 = vrcp.f32 %v1191_v45 }
0x103b   :  { %v2160_v46 = vpop.eup %2159 }
0x103c   :  { %v2162_v47 = vpop.eup %2161  ;;  %v1216_v1 = vsub.f32 1.0, %v2160_v46  ;;  %v1232_v5 = vmul.f32 %v2160_v46, %v1228_v63 }
0x103d   :  { %v1217_v61 = vsub.f32 1.0, %v2162_v47  ;;  %v1233_v2 = vmul.f32 %v2162_v47, %v1229_v59 }
0x1092   :  { %v1199_v48 = vpop.permute.xlu0 %1198  ;;  %v1197_v49 = vpop.permute.xlu1 %1196 }
0x1093   :  { %v1203_v50 = vmul.f32 %v2162_v47, %v1199_v48  ;;  %v1202_v51 = vmul.f32 %v2160_v46, %v1197_v49 }
0x1095   :  { %1208 = vrot.lane.b32.xlu0 %v1203_v50, %s2320_s5  ;;  %1206 = vrot.lane.b32.xlu1 %v1202_v51, %s2320_s5 }
0x1107   :  { %v1209_v52 = vpop.permute.xlu0 %1208  ;;  %v1207_v54 = vpop.permute.xlu1 %1206 }
0x1108   :  { %v1213_v55 = vadd.f32 %v1209_v52, %v2543_v60  ;;  %v1212_v56 = vadd.f32 %v1207_v54, %v2545_v62 }
0x110a   :  { %2163 = vtanh.f32 %v1213_v55 }
0x110b   :  { %2165 = vtanh.f32 %v1212_v56 }
0x1114   :  { %v2164_v57 = vpop.eup %2163 }
0x1115   :  { %v2166_v58 = vpop.eup %2165  ;;  %1222 = vrot.lane.b32.xlu0 %v2164_v57, %s2322_s18 }
0x1116   :  { %1220 = vrot.lane.b32.xlu1 %v2166_v58, %s2322_s18 }
0x1187   :  { %v1223_v0 = vpop.permute.xlu0 %1222 }
0x1188   :  { %v1227_v3 = vmul.f32 %v1223_v0, %v1217_v61  ;;  %v1221_v4 = vpop.permute.xlu1 %1220 }
0x1189   :  { %v1226_v6 = vmul.f32 %v1221_v4, %v1216_v1 }
0x118a   :  { %v1235_v7 = vadd.f32 %v1233_v2, %v1227_v3 }
0x118b   :  { %v1234_v8 = vadd.f32 %v1232_v5, %v1226_v6 }
0x118c   :  { %v1239_v9 = vrot.slane %v1235_v7, 4  ;;  %v1367_v40 = vrot.slane %v1235_v7, 7 }
0x118d   :  { %v1238_v10 = vrot.slane %v1234_v8, 5  ;;  %v1366_v41 = vrot.slane %v1234_v8, 7 }
0x118f   :  { %v1240_v11 = vsel %vm552_vm4, %v1239_v9, %v1238_v10 }
0x1190   :  { %1241 = vrot.lane.b32.xlu1 %v1240_v11, %s2322_s18 }
0x1202   :  { %v1242_v12 = vpop.permute.xlu1 %1241 }
0x1203   :  { %1966 = vmatmul.mubr.msk.f32.vlgmr.msra.gmra.mrb[8].mxu1 %vm209_vm2, %v1242_v12 }
0x1204   :  { %1987 = vmatprep.mubr.msk.f32.mxu1 %vm2318_vm3, %v2319_v43 }
0x12d6   :  { %v1311_v13 = vpop.f32.mrb[8].mxu1 }
0x12d7   :  { %v1312_v14 = vadd.f32 %v2529_v53, %v1311_v13  ;;  %v1967_v15 = vpop.f32.mrb[9].mxu1 }
0x12d9   :  { %v1316_v17 = vrot.slane %v1312_v14, 2  ;;  %v1317_v18 = vrot.slane %v1312_v14, 3 }
0x12db   :  { %1336 = vrot.lane.b32.xlu1 %v1317_v18, %s2320_s5  ;;  %1334 = vrot.lane.b32.xlu0 %v1316_v17, %s2320_s5  ;;  %v1320_v19 = vadd.f32 %v1316_v17, %v2545_v62  ;;  %v1321_v20 = vadd.f32 %v1317_v18, %v2543_v60 }
0x12dd   :  { %v1790_v21 = vmul.f32 -1.442695, %v1320_v19  ;;  %v1791_v22 = vmul.f32 -1.442695, %v1321_v20  ;;  %v1512_v19 = vld [vmem:[#allocation7] sm:$0xff]  ;;  %v1513_v20 = vld [vmem:[#allocation7 + $0x8] sm:$0xff] }
0x12df   :  { %2167 = vpow2.f32 %v1790_v21 }
0x12e0   :  { %2169 = vpow2.f32 %v1791_v22  ;;  %v2066_v22 = vpack.c.bf16 %v1513_v20, %v1512_v19 }
0x12e2   :  { %2067 = vmatpush3.bf16.msra.mxu1 %v2066_v22 }
0x12e3   :  { %2068 = vmatprep.subr.bf16.mxu1 %v2316_v16 }
0x12e9   :  { %v2168_v23 = vpop.eup %2167 }
0x12ea   :  { %v2170_v24 = vpop.eup %2169  ;;  %v1328_v25 = vadd.f32 1.0, %v2168_v23  ;;  %v1514_v23 = vld [vmem:[#allocation7 + $0x10] sm:$0xff] }
0x12eb   :  { %v1329_v26 = vadd.f32 1.0, %v2170_v24  ;;  %v1515_v24 = vld [vmem:[#allocation7 + $0x18] sm:$0xff] }
0x12ec   :  { %2171 = vrcp.f32 %v1328_v25  ;;  %v2069_v25 = vpack.c.bf16 %v1515_v24, %v1514_v23 }
0x12ed   :  { %2173 = vrcp.f32 %v1329_v26 }
0x12ee   :  { %2070 = vmatpush3.bf16.msra.mxu1 %v2069_v25 }
0x12f6   :  { %v2172_v27 = vpop.eup %2171 }
0x12f7   :  { %v2174_v28 = vpop.eup %2173  ;;  %v1354_v45 = vsub.f32 1.0, %v2172_v27  ;;  %v1370_v49 = vmul.f32 %v2172_v27, %v1366_v41 }
0x12f8   :  { %v1355_v42 = vsub.f32 1.0, %v2174_v28  ;;  %v1371_v46 = vmul.f32 %v2174_v28, %v1367_v40 }
0x134d   :  { %v1337_v29 = vpop.permute.xlu1 %1336  ;;  %v1335_v30 = vpop.permute.xlu0 %1334 }
0x134e   :  { %v1341_v31 = vmul.f32 %v2174_v28, %v1337_v29  ;;  %v1340_v32 = vmul.f32 %v2172_v27, %v1335_v30  ;;  %v1603_v29 = vld [vmem:[%s2768_s11] sm:$0xff]  ;;  %v1604_v30 = vld [vmem:[%s2768_s11 + $0x8] sm:$0xff] }
0x1350   :  { %1346 = vrot.lane.b32.xlu1 %v1341_v31, %s2320_s5  ;;  %1344 = vrot.lane.b32.xlu0 %v1340_v32, %s2320_s5 }
0x13c2   :  { %v1347_v33 = vpop.permute.xlu1 %1346  ;;  %v1345_v34 = vpop.permute.xlu0 %1344 }
0x13c3   :  { %v1351_v36 = vadd.f32 %v1347_v33, %v2543_v60  ;;  %v1350_v37 = vadd.f32 %v1345_v34, %v2545_v62  ;;  %v2072_v34 = vpack.c.bf16 %v1604_v30, %v1603_v29 }
0x13c5   :  { %2175 = vtanh.f32 %v1351_v36 }
0x13c6   :  { %2177 = vtanh.f32 %v1350_v37 }
0x13cf   :  { %v2176_v38 = vpop.eup %2175 }
0x13d0   :  { %v2178_v39 = vpop.eup %2177  ;;  %1360 = vrot.lane.b32.xlu1 %v2176_v38, %s2322_s18 }
0x13d1   :  { %1358 = vrot.lane.b32.xlu0 %v2178_v39, %s2322_s18 }
0x1442   :  { %v1361_v44 = vpop.permute.xlu1 %1360 }
0x1443   :  { %v1365_v47 = vmul.f32 %v1361_v44, %v1355_v42  ;;  %v1359_v48 = vpop.permute.xlu0 %1358 }
0x1444   :  { %v1364_v50 = vmul.f32 %v1359_v48, %v1354_v45 }
0x1445   :  { %v2674_v51 = vadd.f32 %v1371_v46, %v1365_v47  ;;  %v1606_v47 = vld [vmem:[%s2768_s11 + $0x18] sm:$0xff] }
0x1446   :  { %v2676_v52 = vadd.f32 %v1370_v49, %v1364_v50  ;;  %v1795_v49 = vld [vmem:[%s2767_s10] ss:$0 sm:$0xff] }
0x1447   :  { %v1377_v54 = vrot.slane %v2674_v51, 5 }
0x1448   :  { %v1376_v55 = vrot.slane %v2676_v52, 6  ;;  %v1504_v26 = vrot.slane %v2676_v52, 7 }
0x144a   :  { %v1378_v56 = vsel %vm552_vm4, %v1377_v54, %v1376_v55 }
0x144b   :  { %1379 = vrot.lane.b32.xlu0 %v1378_v56, %s2322_s18 }
0x14bd   :  { %v1380_v57 = vpop.permute.xlu0 %1379 }
0x14be   :  { %1977 = vmatmul.mubr.msk.f32.vlgmr.msra.gmra.mrb[10].mxu0 %vm209_vm2, %v1380_v57 }
0x14bf   :  { %1998 = vmatprep.mubr.msk.f32.mxu0 %vm2318_vm3, %v2319_v43  ;;  %2073 = vmatpush3.bf16.msra.mxu0 %v2072_v34 }
0x14c0   :  { %2074 = vmatprep.subr.bf16.mxu0 %v2316_v16  ;;  %v1605_v16 = vld [vmem:[%s2768_s11 + $0x10] sm:$0xff] }
0x14c1   :  { %v2075_v48 = vpack.c.bf16 %v1606_v47, %v1605_v16 }
0x14c3   :  { %2076 = vmatpush3.bf16.msra.mxu0 %v2075_v48 }
0x1591   :  { %v1449_v58 = vpop.f32.mrb[10].mxu0 }
0x1592   :  { %v1450_v59 = vadd.f32 %v2529_v53, %v1449_v58  ;;  %v1978_v61 = vpop.f32.mrb[11].mxu0 }
0x1594   :  { %v1454_v63 = vrot.slane %v1450_v59, 1  ;;  %v1455_v0 = vrot.slane %v1450_v59, 2 }
0x1596   :  { %1474 = vrot.lane.b32.xlu0 %v1455_v0, %s2320_s5  ;;  %1472 = vrot.lane.b32.xlu1 %v1454_v63, %s2320_s5  ;;  %v1458_v1 = vadd.f32 %v1454_v63, %v2545_v62  ;;  %v1459_v2 = vadd.f32 %v1455_v0, %v2543_v60 }
0x1598   :  { %v1793_v3 = vmul.f32 -1.442695, %v1458_v1  ;;  %v1794_v4 = vmul.f32 -1.442695, %v1459_v2 }
0x159a   :  { %2179 = vpow2.f32 %v1793_v3 }
0x159b   :  { %2181 = vpow2.f32 %v1794_v4 }
0x15a4   :  { %v2180_v5 = vpop.eup %2179 }
0x15a5   :  { %v2182_v43 = vpop.eup %2181  ;;  %v1466_v6 = vadd.f32 1.0, %v2180_v5 }
0x15a6   :  { %v1467_v7 = vadd.f32 1.0, %v2182_v43 }
0x15a7   :  { %2183 = vrcp.f32 %v1466_v6 }
0x15a8   :  { %2185 = vrcp.f32 %v1467_v7 }
0x15b1   :  { %v2184_v53 = vpop.eup %2183 }
0x15b2   :  { %v2186_v8 = vpop.eup %2185  ;;  %v1492_v28 = vsub.f32 1.0, %v2184_v53  ;;  %v1508_v36 = vmul.f32 %v2184_v53, %v1504_v26 }
0x1608   :  { %v1475_v9 = vpop.permute.xlu0 %1474  ;;  %v1473_v10 = vpop.permute.xlu1 %1472 }
0x1609   :  { %v1479_v11 = vmul.f32 %v2186_v8, %v1475_v9  ;;  %v1478_v12 = vmul.f32 %v2184_v53, %v1473_v10 }
0x160b   :  { %1484 = vrot.lane.b32.xlu0 %v1479_v11, %s2320_s5  ;;  %1482 = vrot.lane.b32.xlu1 %v1478_v12, %s2320_s5 }
0x167d   :  { %v1485_v13 = vpop.permute.xlu0 %1484  ;;  %v1483_v14 = vpop.permute.xlu1 %1482 }
0x167e   :  { %v1489_v15 = vadd.f32 %v1485_v13, %v2543_v60  ;;  %v1488_v17 = vadd.f32 %v1483_v14, %v2545_v62  ;;  %v1505_v60 = vrot.slane %v2674_v51, 7  ;;  %v1493_v62 = vsub.f32 1.0, %v2186_v8 }
0x1680   :  { %2187 = vtanh.f32 %v1489_v15  ;;  %v1509_v31 = vmul.f32 %v2186_v8, %v1505_v60 }
0x1681   :  { %2189 = vtanh.f32 %v1488_v17 }
0x168a   :  { %v2188_v18 = vpop.eup %2187 }
0x168b   :  { %v2190_v21 = vpop.eup %2189  ;;  %1498 = vrot.lane.b32.xlu0 %v2188_v18, %s2322_s18 }
0x168c   :  { %1496 = vrot.lane.b32.xlu1 %v2190_v21, %s2322_s18 }
0x16fd   :  { %v1499_v27 = vpop.permute.xlu0 %1498 }
0x16fe   :  { %v1503_v32 = vmul.f32 %v1499_v27, %v1493_v62  ;;  %v1497_v33 = vpop.permute.xlu1 %1496 }
0x16ff   :  { %v1502_v37 = vmul.f32 %v1497_v33, %v1492_v28 }
0x1700   :  { %v1511_v38 = vadd.f32 %v1509_v31, %v1503_v32 }
0x1701   :  { %v1510_v39 = vadd.f32 %v1508_v36, %v1502_v37 }
0x1702   :  { %v1526_v40 = vrot.slane %v1511_v38, 6 }
0x1703   :  { %v1525_v42 = vrot.slane %v1510_v39, 7  ;;  %1715 = vrot.lane.b32.xlu0 %v1510_v39, %s2322_s18 }
0x1705   :  { %v1527_v41 = vsel %vm552_vm4, %v1526_v40, %v1525_v42 }
0x1706   :  { %1528 = vrot.lane.b32.xlu1 %v1527_v41, %s2322_s18 }
0x170a   :  { %1717 = vrot.lane.b32.xlu1 %v1511_v38, %s2322_s18 }
0x1775   :  { %v1716_v44 = vpop.permute.xlu0 %1715 }
0x1776   :  { %1722 = vst.msk [vmem:[#allocation9 - $0x7] sm:$0x80] %vm1721_vm5, %v1716_v44 }
0x1778   :  { %v1529_v45 = vpop.permute.xlu1 %1528 }
0x1779   :  { %1988 = vmatmul.mubr.msk.f32.vlgmr.msra.gmra.mrb[10].mxu1 %vm209_vm2, %v1529_v45 }
0x177c   :  { %v1718_v46 = vpop.permute.xlu1 %1717 }
0x177d   :  { %1723 = vst.msk [vmem:[#allocation9 - $0x6] sm:$0x80] %vm1721_vm5, %v1718_v46 }
0x184c   :  { %v1598_v50 = vpop.f32.mrb[10].mxu1 }
0x184d   :  { %v1599_v51 = vadd.f32 %v1795_v49, %v1598_v50  ;;  %v1989_v52 = vpop.f32.mrb[11].mxu1 }
0x184f   :  { %v1602_v54 = vmax.f32 %v1599_v51, 0.0 }
0x1851   :  { %1999 = vmatmul.mubr.msk.f32.vlgmr.msra.gmra.mrb[12].mxu0 %vm209_vm2, %v1602_v54 }
0x1852   :  { %2268 = shalt.err (!%p2265_p0)
}
0x1853   :  { %s2269_s10 = scalar_lea.hbm %s2771_s14, 32 }
0x1854   :  { %p2270_p1 = scmp.ne.s32.totalorder %s2771_s14, %s2269_s10  ;;  %p2273_p2 = scmp.lt.u32.totalorder %s2269_s10, %s2771_s14 }
0x1856   :  { %p2275_p3 = pnand %p2273_p2, %p2270_p1 }
0x1858   :  { %2278 = shalt.err (!%p2275_p3)
}
0x1859   :  { %1747 = dma.vmem_to_hbm [thread:$0]  %s1742_s29, 32, %s2771_s14, [#allocation10], %s2313_s7, %s2313_s7, %s2314_s30   ;;  %vm1712_vm6 = vcmask 57344  }
0x185a   :  { %v1797_v55 = vld [vmem:[%s2769_s12] ss:$0 sm:$0xff]  ;;  %s2324_s8 = smov [#allocation8]  }
0x185b   :  { %s1729_s18 = sshll.u32 %s2324_s8, 4  ;;  %s1730_s18 = int_to_ptr.vmem [resolvable:$true] %s1729_s18 }
0x185c   :  { %s2279_s14 = scalar_lea.vmem %s1730_s18, 32  ;;  %p2284_p5 = scmp.lt.s32.totalorder %s1730_s18, %s1730_s18 }
0x185d   :  { %p2280_p4 = scmp.ne.s32.totalorder %s1730_s18, %s2279_s14  ;;  %p2285_p6 = scmp.lt.s32.totalorder %s2279_s14, %s2279_s14 }
0x185f   :  { %p2286_p7 = por %p2285_p6, %p2284_p5 }
0x1861   :  { %p2287_p8 = pnand %p2286_p7, %p2280_p4 }
0x1924   :  { %v1683_v56 = vpop.f32.mrb[12].mxu0 }
0x1925   :  { %v1684_v57 = vadd.f32 %v1797_v55, %v1683_v56  ;;  %v2000_v58 = vpop.f32.mrb[13].mxu0 }
0x1927   :  { %v1694_v59 = vrot.slane %v1684_v57, %v2491_v35 }
0x1929   :  { %v1695_v61 = vcombine.high %v1694_v59, %v1694_v59  ;;  %v1702_v63 = vrot.slane %v1694_v59, %v2491_v35 }
0x192b   :  { %v1709_v0 = vrot.slane %v1695_v61, %v2491_v35  ;;  %1713 = vst.msk [vmem:[#allocation8] sm:$0x1] %vm1712_vm6, %v1702_v63 }
0x192d   :  { %1714 = vst.msk [vmem:[#allocation8 + $0x1] sm:$0x1] %vm1712_vm6, %v1709_v0 }
0x192e   :  { %2290 = shalt.err (!%p2287_p8)
}
0x192f   :  { %s2291_s20 = scalar_lea.hbm %s2770_s13, 32 }
0x1930   :  { %p2292_p9 = scmp.ne.s32.totalorder %s2770_s13, %s2291_s20  ;;  %p2295_p10 = scmp.lt.u32.totalorder %s2291_s20, %s2770_s13 }
0x1932   :  { %p2297_p11 = pnand %p2295_p10, %p2292_p9 }
0x1934   :  { %2300 = shalt.err (!%p2297_p11)
}
0x1935   :  { %1735 = dma.vmem_to_hbm [thread:$0]  %s1730_s18, 32, %s2770_s13, [#allocation4], %s2313_s7, %s2313_s7, %s2314_s30  }
0x1936   :  { %2305 = dma.done.wait [#allocation4], 32  }
0x1937   :  { %2306 = vsyncadd [#allocation4], 4294967264 }
0x1938   :  { %2307 = dma.done.wait [#allocation10], 32  }
0x1939   :  { %2308 = vsyncadd [#allocation10], 4294967264 }
0x193a   :  { %1754 = vsyncpa [#allocation3], 1 }
0x193b   :  { %1755 = vsyncpa [#allocation6], 1 }
0x193c   :  { %1756 = vsyncpa [#allocation4], 1 }
0x193d   :  { %1757 = vsyncpa [#allocation10], 1 }

</bundles_post_ra>
